<compile_context>
chip_gen: v6e
topology: v6e:2x2x1
jax: 0.10.0
libtpu: 0.0.40
codegen_flags: <defaults>
</compile_context>

<pallas_src>
import functools

import jax
import jax.numpy as jnp
from jax.experimental import pallas as pl
from jax.experimental.pallas import tpu as pltpu


def _nkd_kernel(label_ref, ls_ref, lt_ref, out_ref, *, inv_temp, dist_coef):
    labels = label_ref[...]                                    # (TM, 1) int32
    ls = ls_ref[...].astype(jnp.float32)                       # (TM, C) student logits
    lt = lt_ref[...].astype(jnp.float32)                       # (TM, C) teacher logits
    tm, c = ls.shape

    class_ids = jax.lax.broadcasted_iota(jnp.int32, (tm, c), 1)
    mask = class_ids == labels                                 # (TM, C) one-hot bool

    # Gather target logits once (masked select + row-sum); reused everywhere below.
    ls_tgt = jnp.sum(jnp.where(mask, ls, 0.0), axis=1, keepdims=True)     # (TM, 1)
    lt_tgt = jnp.sum(jnp.where(mask, lt, 0.0), axis=1, keepdims=True)     # (TM, 1)

    # ---- soft cross-entropy term: -(w_t * log y_t), per row --------------------
    m_s = jnp.max(ls, axis=1, keepdims=True)
    sum_s = jnp.sum(jnp.exp(ls - m_s), axis=1, keepdims=True)             # exp #1
    log_y_t = (ls_tgt - m_s) - jnp.log(sum_s)                             # (TM, 1)

    m_t = jnp.max(lt, axis=1, keepdims=True)
    sum_t = jnp.sum(jnp.exp(lt - m_t), axis=1, keepdims=True)             # exp #2
    w_t = jnp.exp(lt_tgt - m_t) * pl.reciprocal(sum_t, approx=True)       # (TM, 1)

    soft_rows = -(w_t * log_y_t)                                          # (TM, 1)

    # ---- non-target distillation term ------------------------------------------
    # Teacher: np_t = T_i / (1 - T_t) = exp_t / (sum exp_t - exp_t[label]); 0 at label.
    zt = jnp.where(mask, lt - 1000.0, lt)
    zs = jnp.where(mask, ls - 1000.0, ls)
    if inv_temp != 1.0:          # static Python condition -> no-op when temp == 1
        zt = zt * inv_temp
        zs = zs * inv_temp

    m_zt = jnp.max(zt, axis=1, keepdims=True)
    e_t = jnp.exp(zt - m_zt)                                              # exp #3
    e_t_tgt = jnp.exp((lt_tgt - 1000.0) * inv_temp - m_zt)                # (TM, 1) exp
    den_t = jnp.sum(e_t, axis=1, keepdims=True) - e_t_tgt                 # == sum*(1-T_t)
    np_t = e_t * pl.reciprocal(jnp.maximum(den_t, 1e-30), approx=True)    # (TM, C)

    # Student: log np_s = log(S_i / (1 - S_t)) = d_s - log(sum exp_s - exp_s[label]).
    m_zs = jnp.max(zs, axis=1, keepdims=True)
    d_s = zs - m_zs
    e_s = jnp.exp(d_s)                                                    # exp #4
    e_s_tgt = jnp.exp((ls_tgt - 1000.0) * inv_temp - m_zs)                # (TM, 1) exp
    den_s = jnp.sum(e_s, axis=1, keepdims=True) - e_s_tgt
    log_np_s = d_s - jnp.log(jnp.maximum(den_s, 1e-30))                   # (TM, C)

    # Target column contributes 0 (torch sets np_t[label] = 0, np_s[label] = 1).
    dist_rows = jnp.sum(jnp.where(mask, 0.0, np_t * log_np_s),
                        axis=1, keepdims=True)                            # (TM, 1)

    # Fused per-row loss (static -alpha*temp^2 folded in) -> one scalar per block.
    per_row = soft_rows + dist_coef * dist_rows                           # (TM, 1)
    out_ref[...] = jnp.sum(per_row, axis=0, keepdims=True)[None]          # (1, 1, 1)


def _sublane_align(itemsize):
    return {4: 8, 2: 16, 1: 32}.get(int(itemsize), 8)


def _choose_block_rows(n_rows, n_cols, itemsize_s, itemsize_t, vmem_budget_bytes,
                       max_block_rows=1024):
    """Largest row tile (sublane-aligned divisor of N, capped for pipelining) fitting
    the VMEM budget with double-buffered student+teacher input blocks plus f32
    working temporaries."""
    align = max(_sublane_align(itemsize_s), _sublane_align(itemsize_t))
    # 2x double-buffered student+teacher blocks + ~8 live (rows, C) f32 temporaries.
    per_row = n_cols * (2 * (itemsize_s + itemsize_t) + 8 * 4) + 64
    cap = max(align, int(vmem_budget_bytes // max(per_row, 1)))
    cap = min(cap, max_block_rows, n_rows)
    best = None
    for r in range(align, cap + 1, align):
        if n_rows % r == 0:
            best = r
    if best is None:
        # Fall back to one full-array block (block == full dims is always legal).
        # TODO(synk): pad N up to a sublane multiple for awkward batch sizes.
        best = n_rows
    return best


def nkd_loss(logit_s, logit_t, gt_label, temp=1.0, alpha=1.0,
             block_rows=None, vmem_budget_bytes=32 * 1024 * 1024):
    """NKD loss (forward). logit_s/logit_t: [N, C] float (kept in native dtype in HBM);
    gt_label: [N] integer labels or [N, C] soft labels."""
    if gt_label.ndim > 1:
        label = jnp.argmax(gt_label, axis=1)
    else:
        label = gt_label
    label = label.astype(jnp.int32).reshape(-1, 1)             # (N, 1)

    n, c = logit_s.shape
    assert logit_t.shape == (n, c)

    if block_rows is None:
        block_rows = _choose_block_rows(n, c, logit_s.dtype.itemsize,
                                        logit_t.dtype.itemsize, vmem_budget_bytes)
    assert n % block_rows == 0, "N must be a multiple of block_rows"
    n_blocks = n // block_rows

    kernel = functools.partial(
        _nkd_kernel,
        inv_temp=1.0 / float(temp),
        dist_coef=-float(alpha) * float(temp) ** 2,
    )
    parts = pl.pallas_call(
        kernel,
        out_shape=jax.ShapeDtypeStruct((n_blocks, 1, 1), jnp.float32),
        grid_spec=pltpu.PrefetchScalarGridSpec(
            num_scalar_prefetch=0,
            grid=(n_blocks,),
            in_specs=[
                pl.BlockSpec((block_rows, 1), lambda i: (i, 0)),   # labels
                pl.BlockSpec((block_rows, c), lambda i: (i, 0)),   # student logits (native dtype)
                pl.BlockSpec((block_rows, c), lambda i: (i, 0)),   # teacher logits (native dtype)
            ],
            out_specs=pl.BlockSpec((1, 1, 1), lambda i: (i, 0, 0)),
        ),
        compiler_params=pltpu.CompilerParams(
            # Row axis is embarrassingly parallel -> shards across TensorCores on
            # multi-TC parts (v7x).  Explicit scoped-VMEM limit keeps the tile sizing
            # honest on 64 MiB-VMEM parts and raises the 16 MiB v5e default.
            dimension_semantics=("parallel",),
            vmem_limit_bytes=int(vmem_budget_bytes),
        ),
    )(label, logit_s, logit_t)

    return jnp.sum(parts) / n


def _nkd_loss_reference(logit_s, logit_t, gt_label, temp=1.0, alpha=1.0):
    """Plain-JAX transcription of the torch module (forward only)."""
    if gt_label.ndim > 1:
        label = jnp.argmax(gt_label, axis=1)
    else:
        label = gt_label
    label = label.astype(jnp.int32)
    ls = logit_s.astype(jnp.float32)
    lt = logit_t.astype(jnp.float32)
    _, c = ls.shape
    y_i = jax.nn.softmax(ls, axis=1)
    t_i = jax.nn.softmax(lt, axis=1)
    y_t = jnp.take_along_axis(y_i, label[:, None], axis=1)
    w_t = jnp.take_along_axis(t_i, label[:, None], axis=1)
    maskb = jax.nn.one_hot(label, c, dtype=jnp.float32).astype(bool)
    ls_m = jnp.where(maskb, ls - 1000.0, ls)
    lt_m = jnp.where(maskb, lt - 1000.0, lt)
    T_i = jax.nn.softmax(lt_m / temp, axis=1)
    S_i = jax.nn.softmax(ls_m / temp, axis=1)
    T_t = jnp.take_along_axis(T_i, label[:, None], axis=1)
    S_t = jnp.take_along_axis(S_i, label[:, None], axis=1)
    np_t = jnp.where(maskb, 0.0, T_i / (1.0 - T_t))
    np_s = jnp.where(maskb, 1.0, S_i / (1.0 - S_t))
    soft_loss = -jnp.mean(w_t * jnp.log(y_t))
    distributed_loss = jnp.mean(jnp.sum(np_t * jnp.log(np_s), axis=1))
    distributed_loss = -alpha * temp ** 2 * distributed_loss
    return soft_loss + distributed_loss


if __name__ == "__main__":
    key = jax.random.PRNGKey(0)
    k1, k2, k3, k4 = jax.random.split(key, 4)

    # Small demo shapes: 128 rows x 128 classes, bf16 logits (native-dtype DMA path).
    N, C = 128, 128
    logit_s = (2.0 * jax.random.normal(k1, (N, C), dtype=jnp.float32)).astype(jnp.bfloat16)
    logit_t = (2.0 * jax.random.normal(k2, (N, C), dtype=jnp.float32)).astype(jnp.bfloat16)
    gt_hard = jax.random.randint(k3, (N,), 0, C, dtype=jnp.int32)
    gt_soft = jax.random.normal(k4, (N, C), dtype=jnp.float32)   # exercises argmax branch

    # 1) auto-sized row tile (single block at this size), hard labels.
    loss1 = nkd_loss(logit_s, logit_t, gt_hard, temp=1.0, alpha=1.0)
    # 2) explicit 32-row tiles -> 4 grid steps (multi-block partial sums), soft labels.
    loss2 = nkd_loss(logit_s, logit_t, gt_soft, temp=2.0, alpha=1.5, block_rows=32)
    jax.block_until_ready((loss1, loss2))

    # Sanity check against a plain-JAX reference (loose tol: approx EUP reciprocals).
    ref1 = _nkd_loss_reference(logit_s, logit_t, gt_hard, temp=1.0, alpha=1.0)
    ref2 = _nkd_loss_reference(logit_s, logit_t, gt_soft, temp=2.0, alpha=1.5)
    ok1 = bool(jnp.allclose(loss1, ref1, rtol=2e-2, atol=2e-2))
    ok2 = bool(jnp.allclose(loss2, ref2, rtol=2e-2, atol=2e-2))
    if not (ok1 and ok2):
        raise AssertionError(
            f"NKD mismatch: kernel=({float(loss1)}, {float(loss2)}) "
            f"reference=({float(ref1)}, {float(ref2)})")

    print("KERNEL_OK")
</pallas_src>

<mosaic_0001>
module attributes {stable_mosaic.version = 11 : i64} {
  func.func @_nkd_kernel(%arg0: i32, %arg1: memref<128x1xi32, #tpu.memory_space<vmem>>, %arg2: memref<128x128xbf16, #tpu.memory_space<vmem>>, %arg3: memref<128x128xbf16, #tpu.memory_space<vmem>>, %arg4: memref<1x1x1xf32, #tpu.memory_space<vmem>>) attributes {dimension_semantics = [#tpu.dimension_semantics<parallel>], iteration_bounds = array<i64: 1>, scalar_prefetch = 0 : i64, scratch_operands = 0 : i64, tpu.core_type = #tpu.core_type<tc>, window_params = [{transform_indices = @transform_0, window_bounds = array<i64: 128, 1>}, {transform_indices = @transform_1, window_bounds = array<i64: 128, 128>}, {transform_indices = @transform_2, window_bounds = array<i64: 128, 128>}, {transform_indices = @transform_3, window_bounds = array<i64: 1, 1, 1>}]} {
    %c0 = arith.constant 0 : index
    %c0_0 = arith.constant 0 : index
    %0 = vector.load %arg1[%c0, %c0_0] : memref<128x1xi32, #tpu.memory_space<vmem>>, vector<128x1xi32>
    %c0_1 = arith.constant 0 : index
    %c0_2 = arith.constant 0 : index
    %1 = vector.load %arg2[%c0_1, %c0_2] : memref<128x128xbf16, #tpu.memory_space<vmem>>, vector<128x128xbf16>
    %2 = arith.extf %1 : vector<128x128xbf16> to vector<128x128xf32>
    %c0_3 = arith.constant 0 : index
    %c0_4 = arith.constant 0 : index
    %3 = vector.load %arg3[%c0_3, %c0_4] : memref<128x128xbf16, #tpu.memory_space<vmem>>, vector<128x128xbf16>
    %4 = arith.extf %3 : vector<128x128xbf16> to vector<128x128xf32>
    %5 = tpu.iota {dimensions = array<i32: 1>} : vector<128x128xi32>
    %6 = vector.broadcast %0 : vector<128x1xi32> to vector<128x128xi32>
    %7 = arith.cmpi eq, %5, %6 : vector<128x128xi32>
    %cst = arith.constant 0.000000e+00 : f32
    %8 = vector.broadcast %cst : f32 to vector<128x128xf32>
    %9 = arith.select %7, %2, %8 : vector<128x128xi1>, vector<128x128xf32>
    %cst_5 = arith.constant dense<0.000000e+00> : vector<128xf32>
    %10 = vector.multi_reduction <add>, %9, %cst_5 [1] : vector<128x128xf32> to vector<128xf32>
    %11 = vector.shape_cast %10 : vector<128xf32> to vector<128x1xf32>
    %cst_6 = arith.constant 0.000000e+00 : f32
    %12 = vector.broadcast %cst_6 : f32 to vector<128x128xf32>
    %13 = arith.select %7, %4, %12 : vector<128x128xi1>, vector<128x128xf32>
    %cst_7 = arith.constant dense<0.000000e+00> : vector<128xf32>
    %14 = vector.multi_reduction <add>, %13, %cst_7 [1] : vector<128x128xf32> to vector<128xf32>
    %15 = vector.shape_cast %14 : vector<128xf32> to vector<128x1xf32>
    %cst_8 = arith.constant dense<0xFF800000> : vector<128xf32>
    %16 = vector.multi_reduction <maximumf>, %2, %cst_8 [1] : vector<128x128xf32> to vector<128xf32>
    %17 = vector.shape_cast %16 : vector<128xf32> to vector<128x1xf32>
    %18 = vector.broadcast %17 : vector<128x1xf32> to vector<128x128xf32>
    %19 = arith.subf %2, %18 : vector<128x128xf32>
    %20 = math.exp %19 : vector<128x128xf32>
    %cst_9 = arith.constant dense<0.000000e+00> : vector<128xf32>
    %21 = vector.multi_reduction <add>, %20, %cst_9 [1] : vector<128x128xf32> to vector<128xf32>
    %22 = vector.shape_cast %21 : vector<128xf32> to vector<128x1xf32>
    %23 = arith.subf %11, %17 : vector<128x1xf32>
    %24 = math.log %22 : vector<128x1xf32>
    %25 = arith.subf %23, %24 : vector<128x1xf32>
    %cst_10 = arith.constant dense<0xFF800000> : vector<128xf32>
    %26 = vector.multi_reduction <maximumf>, %4, %cst_10 [1] : vector<128x128xf32> to vector<128xf32>
    %27 = vector.shape_cast %26 : vector<128xf32> to vector<128x1xf32>
    %28 = vector.broadcast %27 : vector<128x1xf32> to vector<128x128xf32>
    %29 = arith.subf %4, %28 : vector<128x128xf32>
    %30 = math.exp %29 : vector<128x128xf32>
    %cst_11 = arith.constant dense<0.000000e+00> : vector<128xf32>
    %31 = vector.multi_reduction <add>, %30, %cst_11 [1] : vector<128x128xf32> to vector<128xf32>
    %32 = vector.shape_cast %31 : vector<128xf32> to vector<128x1xf32>
    %33 = arith.subf %15, %27 : vector<128x1xf32>
    %34 = math.exp %33 : vector<128x1xf32>
    %35 = tpu.reciprocal %32 {approx = true} : vector<128x1xf32> -> vector<128x1xf32>
    %36 = arith.mulf %34, %35 : vector<128x1xf32>
    %37 = arith.mulf %36, %25 : vector<128x1xf32>
    %cst_12 = arith.constant 0.000000e+00 : f32
    %38 = vector.broadcast %cst_12 : f32 to vector<128x1xf32>
    %39 = arith.subf %38, %37 : vector<128x1xf32>
    %cst_13 = arith.constant 1.000000e+03 : f32
    %40 = vector.broadcast %cst_13 : f32 to vector<128x128xf32>
    %41 = arith.subf %4, %40 : vector<128x128xf32>
    %42 = arith.select %7, %41, %4 : vector<128x128xi1>, vector<128x128xf32>
    %cst_14 = arith.constant 1.000000e+03 : f32
    %43 = vector.broadcast %cst_14 : f32 to vector<128x128xf32>
    %44 = arith.subf %2, %43 : vector<128x128xf32>
    %45 = arith.select %7, %44, %2 : vector<128x128xi1>, vector<128x128xf32>
    %cst_15 = arith.constant dense<0xFF800000> : vector<128xf32>
    %46 = vector.multi_reduction <maximumf>, %42, %cst_15 [1] : vector<128x128xf32> to vector<128xf32>
    %47 = vector.shape_cast %46 : vector<128xf32> to vector<128x1xf32>
    %48 = vector.broadcast %47 : vector<128x1xf32> to vector<128x128xf32>
    %49 = arith.subf %42, %48 : vector<128x128xf32>
    %50 = math.exp %49 : vector<128x128xf32>
    %cst_16 = arith.constant 1.000000e+03 : f32
    %51 = vector.broadcast %cst_16 : f32 to vector<128x1xf32>
    %52 = arith.subf %15, %51 : vector<128x1xf32>
    %cst_17 = arith.constant 1.000000e+00 : f32
    %53 = vector.broadcast %cst_17 : f32 to vector<128x1xf32>
    %54 = arith.mulf %52, %53 : vector<128x1xf32>
    %55 = arith.subf %54, %47 : vector<128x1xf32>
    %56 = math.exp %55 : vector<128x1xf32>
    %cst_18 = arith.constant dense<0.000000e+00> : vector<128xf32>
    %57 = vector.multi_reduction <add>, %50, %cst_18 [1] : vector<128x128xf32> to vector<128xf32>
    %58 = vector.shape_cast %57 : vector<128xf32> to vector<128x1xf32>
    %59 = arith.subf %58, %56 : vector<128x1xf32>
    %cst_19 = arith.constant 1.000000e-30 : f32
    %60 = vector.broadcast %cst_19 : f32 to vector<128x1xf32>
    %61 = arith.maximumf %59, %60 : vector<128x1xf32>
    %62 = tpu.reciprocal %61 {approx = true} : vector<128x1xf32> -> vector<128x1xf32>
    %63 = vector.broadcast %62 : vector<128x1xf32> to vector<128x128xf32>
    %64 = arith.mulf %50, %63 : vector<128x128xf32>
    %cst_20 = arith.constant dense<0xFF800000> : vector<128xf32>
    %65 = vector.multi_reduction <maximumf>, %45, %cst_20 [1] : vector<128x128xf32> to vector<128xf32>
    %66 = vector.shape_cast %65 : vector<128xf32> to vector<128x1xf32>
    %67 = vector.broadcast %66 : vector<128x1xf32> to vector<128x128xf32>
    %68 = arith.subf %45, %67 : vector<128x128xf32>
    %69 = math.exp %68 : vector<128x128xf32>
    %cst_21 = arith.constant 1.000000e+03 : f32
    %70 = vector.broadcast %cst_21 : f32 to vector<128x1xf32>
    %71 = arith.subf %11, %70 : vector<128x1xf32>
    %cst_22 = arith.constant 1.000000e+00 : f32
    %72 = vector.broadcast %cst_22 : f32 to vector<128x1xf32>
    %73 = arith.mulf %71, %72 : vector<128x1xf32>
    %74 = arith.subf %73, %66 : vector<128x1xf32>
    %75 = math.exp %74 : vector<128x1xf32>
    %cst_23 = arith.constant dense<0.000000e+00> : vector<128xf32>
    %76 = vector.multi_reduction <add>, %69, %cst_23 [1] : vector<128x128xf32> to vector<128xf32>
    %77 = vector.shape_cast %76 : vector<128xf32> to vector<128x1xf32>
    %78 = arith.subf %77, %75 : vector<128x1xf32>
    %cst_24 = arith.constant 1.000000e-30 : f32
    %79 = vector.broadcast %cst_24 : f32 to vector<128x1xf32>
    %80 = arith.maximumf %78, %79 : vector<128x1xf32>
    %81 = math.log %80 : vector<128x1xf32>
    %82 = vector.broadcast %81 : vector<128x1xf32> to vector<128x128xf32>
    %83 = arith.subf %68, %82 : vector<128x128xf32>
    %84 = arith.mulf %64, %83 : vector<128x128xf32>
    %cst_25 = arith.constant 0.000000e+00 : f32
    %85 = vector.broadcast %cst_25 : f32 to vector<128x128xf32>
    %86 = arith.select %7, %85, %84 : vector<128x128xi1>, vector<128x128xf32>
    %cst_26 = arith.constant dense<0.000000e+00> : vector<128xf32>
    %87 = vector.multi_reduction <add>, %86, %cst_26 [1] : vector<128x128xf32> to vector<128xf32>
    %88 = vector.shape_cast %87 : vector<128xf32> to vector<128x1xf32>
    %cst_27 = arith.constant -1.000000e+00 : f32
    %89 = vector.broadcast %cst_27 : f32 to vector<128x1xf32>
    %90 = arith.mulf %89, %88 : vector<128x1xf32>
    %91 = arith.addf %39, %90 : vector<128x1xf32>
    %cst_28 = arith.constant dense<0.000000e+00> : vector<1xf32>
    %92 = vector.multi_reduction <add>, %91, %cst_28 [0] : vector<128x1xf32> to vector<1xf32>
    %93 = vector.shape_cast %92 : vector<1xf32> to vector<1x1xf32>
    %94 = vector.shape_cast %93 : vector<1x1xf32> to vector<1x1x1xf32>
    %c0_29 = arith.constant 0 : index
    %c0_30 = arith.constant 0 : index
    %c0_31 = arith.constant 0 : index
    %95 = vector.load %arg4[%c0_29, %c0_30, %c0_31] : memref<1x1x1xf32, #tpu.memory_space<vmem>>, vector<1x1x1xf32>
    tpu.vector_store %arg4[%c0_29, %c0_30, %c0_31], %94 {strides = array<i32>} : memref<1x1x1xf32, #tpu.memory_space<vmem>>, vector<1x1x1xf32>,
    return
  }
  func.func @transform_0(%arg0: i32) -> (i32, i32) {
    %c0_i32 = arith.constant 0 : i32
    %c0_i32_0 = arith.constant 0 : i32
    return %arg0, %c0_i32 : i32, i32
  }
  func.func @transform_1(%arg0: i32) -> (i32, i32) {
    %c0_i32 = arith.constant 0 : i32
    %c0_i32_0 = arith.constant 0 : i32
    return %arg0, %c0_i32 : i32, i32
  }
  func.func @transform_2(%arg0: i32) -> (i32, i32) {
    %c0_i32 = arith.constant 0 : i32
    %c0_i32_0 = arith.constant 0 : i32
    return %arg0, %c0_i32 : i32, i32
  }
  func.func @transform_3(%arg0: i32) -> (i32, i32, i32) {
    %c0_i32 = arith.constant 0 : i32
    %c0_i32_0 = arith.constant 0 : i32
    %c0_i32_1 = arith.constant 0 : i32
    return %arg0, %c0_i32, %c0_i32_0 : i32, i32, i32
  }
}

</mosaic_0001>

<bundles_post_ra>
// kernel: tpu_custom_call.1
= control target key start
LH: loop header
LB: loop body
LE: loop exit
PB: predicated region body
PF: predicated region fallthrough
CT: control target
= control target key end

     0   :  { %v1870_v2 = vmov 0   ;;  %s3205_s0 = inlined_call_operand.vmem [shape: s32[128,1], index: 0, kind: input, shape index: {}]   ;;  %s3206_s1 = inlined_call_operand.vmem [shape: bf16[128,128], index: 1, kind: input, shape index: {}]   ;;  %s3207_s2 = inlined_call_operand.vmem [shape: bf16[128,128], index: 2, kind: input, shape index: {}]   ;;  %s3208_s3 = inlined_call_operand.hbm [shape: f32[1,1,1], index: 3, kind: output, shape index: {}]  }
   0x1   :  { %v17_v0 = vld [vmem:[%s3205_s0 + $0x10] sm:$0xff]  ;;  %v15_v1 = vld [vmem:[%s3205_s0] sm:$0xff]  ;;  %1495 = vset.pattern.permute.xlu1 %v1870_v2  ;;  %1494 = vset.pattern.permute.xlu0 %v1870_v2  ;;  %v18_v3 = vld [vmem:[%s3205_s0 + $0x18] sm:$0xff] }
   0x2   :  { %104 = vperm.xlu1 %1495, %v17_v0   ;;  %98 = vperm.xlu0 %1494, %v15_v1   ;;  %v16_v4 = vld [vmem:[%s3205_s0 + $0x8] sm:$0xff]  ;;  %v19_v6 = vld [vmem:[%s3205_s0 + $0x20] sm:$0xff] }
   0x3   :  { %v20_v5 = vld [vmem:[%s3205_s0 + $0x28] sm:$0xff] }
   0x6   :  { %107 = vperm.xlu1 %1495, %v18_v3   ;;  %101 = vperm.xlu0 %1494, %v16_v4  }
   0x7   :  { %8 = vsyncpa [#allocation3], 0  ;;  %v22_v7 = vld [vmem:[%s3205_s0 + $0x38] sm:$0xff]  ;;  %v21_v8 = vld [vmem:[%s3205_s0 + $0x30] sm:$0xff]  ;;  %v95_v17 = vlaneseq  ;;  %v3328_v24 = vmov 0  ;;  %v3331_v25 = vmov 0 }
   0x8   :  { %v24_v9 = vld [vmem:[%s3205_s0 + $0x48] sm:$0xff]  ;;  %v23_v10 = vld [vmem:[%s3205_s0 + $0x40] sm:$0xff]  ;;  %v26_v11 = vld [vmem:[%s3205_s0 + $0x58] sm:$0xff]  ;;  %v3334_v32 = vmov 0  ;;  %v3337_v35 = vmov 0  ;;  %v3340_v40 = vmov 0 }
   0x9   :  { %v25_v12 = vld [vmem:[%s3205_s0 + $0x50] sm:$0xff]  ;;  %v28_v13 = vld [vmem:[%s3205_s0 + $0x68] sm:$0xff]  ;;  %v27_v14 = vld [vmem:[%s3205_s0 + $0x60] sm:$0xff]  ;;  %v1940_v18 = vand.u32 127, %v95_v17  ;;  %v3343_v44 = vmov 0  ;;  %v3346_v49 = vmov 0 }
   0xa   :  { %113 = vperm.xlu1 %1495, %v20_v5   ;;  %110 = vperm.xlu0 %1494, %v19_v6   ;;  %v30_v15 = vld [vmem:[%s3205_s0 + $0x78] sm:$0xff]  ;;  %v29_v16 = vld [vmem:[%s3205_s0 + $0x70] sm:$0xff]  ;;  %v1415_v19 = vld [vmem:[%s3206_s1] sm:$0xff]   ;;  %v3349_v53 = vmov 0  ;;  %v3352_v58 = vmov 0  ;;  %v3355_v62 = vmov 0 }
   0xb   :  { %v1478_v20 = vld [vmem:[%s3206_s1 + $0x8] sm:$0xff]   ;;  %v1948_v23 = vunpack.c.l.bf16 %v1415_v19  ;;  %v1968_v31 = vunpack.c.h.bf16 %v1415_v19  ;;  %v1479_v33 = vld [vmem:[%s3206_s1 + $0x10] sm:$0xff]   ;;  %v1480_v41 = vld [vmem:[%s3206_s1 + $0x18] sm:$0xff]   ;;  %v3358_v3 = vmov 0 }
   0xc   :  { %v1963_v27 = vunpack.c.l.bf16 %v1478_v20  ;;  %v1986_v38 = vunpack.c.h.bf16 %v1478_v20  ;;  %v1988_v39 = vunpack.c.l.bf16 %v1479_v33  ;;  %v2009_v47 = vunpack.c.h.bf16 %v1479_v33  ;;  %v1481_v50 = vld [vmem:[%s3206_s1 + $0x20] sm:$0xff]   ;;  %v1482_v59 = vld [vmem:[%s3206_s1 + $0x28] sm:$0xff]   ;;  %v1483_v4 = vld [vmem:[%s3206_s1 + $0x30] sm:$0xff]  }
   0xd   :  { %v2011_v48 = vunpack.c.l.bf16 %v1480_v41  ;;  %v2032_v56 = vunpack.c.h.bf16 %v1480_v41  ;;  %v2034_v57 = vunpack.c.l.bf16 %v1481_v50  ;;  %v2055_v1 = vunpack.c.h.bf16 %v1481_v50 }
   0xe   :  { %119 = vperm.xlu1 %1495, %v22_v7   ;;  %116 = vperm.xlu0 %1494, %v21_v8   ;;  %v2057_v2 = vunpack.c.l.bf16 %v1482_v59  ;;  %v3361_v7 = vmov 0  ;;  %v2101_v20 = vunpack.c.h.bf16 %v1483_v4 }
  0x12   :  { %125 = vperm.xlu1 %1495, %v24_v9   ;;  %122 = vperm.xlu0 %1494, %v23_v10   ;;  %v2078_v10 = vunpack.c.h.bf16 %v1482_v59 }
  0x16   :  { %131 = vperm.xlu1 %1495, %v26_v11   ;;  %128 = vperm.xlu0 %1494, %v25_v12   ;;  %v2080_v11 = vunpack.c.l.bf16 %v1483_v4  ;;  %v3364_v12 = vmov 0 }
  0x1a   :  { %137 = vperm.xlu1 %1495, %v28_v13   ;;  %134 = vperm.xlu0 %1494, %v27_v14   ;;  %v1484_v13 = vld [vmem:[%s3206_s1 + $0x38] sm:$0xff]  }
  0x1b   :  { %v2124_v33 = vunpack.c.h.bf16 %v1484_v13 }
  0x1d   :  { %3376 = vst [vmem:[#allocation21_spill] sm:$0xff] %v2124_v33 }
  0x1e   :  { %143 = vperm.xlu1 %1495, %v30_v15   ;;  %140 = vperm.xlu0 %1494, %v29_v16   ;;  %v3367_v16 = vmov 0 }
  0x7d   :  { %v105_v21 = vpop.permute.xlu1 %104  ;;  %v99_v22 = vpop.permute.xlu0 %98 }
  0x7e   :  { %vm1951_vm0 = vcmp.eq.s32.totalorder %v1940_v18, %v105_v21  ;;  %vm1956_vm1 = vcmp.eq.s32.totalorder %v1940_v18, %v99_v22  ;;  %v2103_v21 = vunpack.c.l.bf16 %v1484_v13  ;;  %v3370_v22 = vmov 0 }
  0x7f   :  { %v3329_v24 = vsel %vm1951_vm0, 4294967295, %v3328_v24  ;;  %v3332_v25 = vsel %vm1956_vm1, 4294967295, %v3331_v25  ;;  %v161_v26 = vsel %vm1956_vm1, %v1948_v23, 0.0  ;;  %v163_v30 = vsel %vm1951_vm0, %v1963_v27, 0.0 }
  0x80   :  { %3330 = vst [vmem:[#allocation5_spill] sm:$0xff] %v3329_v24  ;;  %3333 = vst [vmem:[#allocation6_spill] sm:$0xff] %v3332_v25  ;;  %177 = vadd.xlane.f32.xlu0 %v161_v26  ;;  %v1447_v26 = vld [vmem:[%s3207_s2] sm:$0xff]   ;;  %v1378_v24 = vadd.f32 -1000.0, %v2080_v11 }
  0x81   :  { %v108_v28 = vpop.permute.xlu1 %107  ;;  %v102_v29 = vpop.permute.xlu0 %101  ;;  %v2137_v41 = vunpack.c.h.bf16 %v1447_v26 }
  0x82   :  { %vm1971_vm2 = vcmp.eq.s32.totalorder %v1940_v18, %v102_v29  ;;  %vm1982_vm3 = vcmp.eq.s32.totalorder %v1940_v18, %v108_v28 }
  0x83   :  { %v3335_v32 = vsel %vm1971_vm2, 4294967295, %v3334_v32  ;;  %v162_v34 = vsel %vm1971_vm2, %v1968_v31, 0.0  ;;  %v3338_v35 = vsel %vm1982_vm3, 4294967295, %v3337_v35  ;;  %v164_v42 = vsel %vm1982_vm3, %v1986_v38, 0.0 }
  0x84   :  { %3336 = vst [vmem:[#allocation7_spill] sm:$0xff] %v3335_v32  ;;  %3339 = vst [vmem:[#allocation8_spill] sm:$0xff] %v3338_v35  ;;  %181 = vadd.xlane.f32.xlu0 %v163_v30  ;;  %179 = vadd.xlane.f32.xlu1 %v162_v34  ;;  %v3373_v30 = vmov 0  ;;  %v2126_v34 = vunpack.c.l.bf16 %v1447_v26  ;;  %v1377_v35 = vadd.f32 -1000.0, %v2078_v10 }
  0x85   :  { %v114_v36 = vpop.permute.xlu1 %113  ;;  %v111_v37 = vpop.permute.xlu0 %110 }
  0x86   :  { %vm1991_vm4 = vcmp.eq.s32.totalorder %v1940_v18, %v111_v37  ;;  %vm2005_vm5 = vcmp.eq.s32.totalorder %v1940_v18, %v114_v36  ;;  %v1485_v36 = vld [vmem:[%s3207_s2 + $0x8] sm:$0xff]  }
  0x87   :  { %v3341_v40 = vsel %vm1991_vm4, 4294967295, %v3340_v40  ;;  %v165_v43 = vsel %vm1991_vm4, %v1988_v39, 0.0  ;;  %v3344_v44 = vsel %vm2005_vm5, 4294967295, %v3343_v44  ;;  %v166_v51 = vsel %vm2005_vm5, %v2009_v47, 0.0 }
  0x88   :  { %3342 = vst [vmem:[#allocation9_spill] sm:$0xff] %v3341_v40  ;;  %3345 = vst [vmem:[#allocation10_spill] sm:$0xff] %v3344_v44  ;;  %183 = vadd.xlane.f32.xlu0 %v164_v42  ;;  %185 = vadd.xlane.f32.xlu1 %v165_v43  ;;  %v2139_v42 = vunpack.c.l.bf16 %v1485_v36  ;;  %v1486_v43 = vld [vmem:[%s3207_s2 + $0x10] sm:$0xff]   ;;  %v2150_v50 = vunpack.c.h.bf16 %v1485_v36  ;;  %v1368_v36 = vadd.f32 -1000.0, %v1963_v27 }
  0x89   :  { %v120_v45 = vpop.permute.xlu1 %119  ;;  %v117_v46 = vpop.permute.xlu0 %116  ;;  %v2163_v59 = vunpack.c.h.bf16 %v1486_v43 }
  0x8a   :  { %vm2014_vm6 = vcmp.eq.s32.totalorder %v1940_v18, %v117_v46  ;;  %vm2028_vm7 = vcmp.eq.s32.totalorder %v1940_v18, %v120_v45  ;;  %v210_v45 = vsel %vm1971_vm2, %v2137_v41, 0.0  ;;  %v211_v46 = vsel %vm1951_vm0, %v2139_v42, 0.0 }
  0x8b   :  { %v3347_v49 = vsel %vm2014_vm6, 4294967295, %v3346_v49  ;;  %v167_v52 = vsel %vm2014_vm6, %v2011_v48, 0.0  ;;  %v3350_v53 = vsel %vm2028_vm7, 4294967295, %v3349_v53  ;;  %v168_v60 = vsel %vm2028_vm7, %v2032_v56, 0.0 }
  0x8c   :  { %3348 = vst [vmem:[#allocation11_spill] sm:$0xff] %v3347_v49  ;;  %3351 = vst [vmem:[#allocation12_spill] sm:$0xff] %v3350_v53  ;;  %187 = vadd.xlane.f32.xlu0 %v166_v51  ;;  %189 = vadd.xlane.f32.xlu1 %v167_v52  ;;  %v2152_v51 = vunpack.c.l.bf16 %v1486_v43  ;;  %v1487_v52 = vld [vmem:[%s3207_s2 + $0x18] sm:$0xff]   ;;  %v1352_v43 = vadd.f32 -1000.0, %v2139_v42  ;;  %v1376_v49 = vadd.f32 -1000.0, %v2057_v2 }
  0x8d   :  { %v126_v54 = vpop.permute.xlu1 %125  ;;  %v123_v55 = vpop.permute.xlu0 %122  ;;  %v2176_v4 = vunpack.c.h.bf16 %v1487_v52 }
  0x8e   :  { %vm2037_vm8 = vcmp.eq.s32.totalorder %v1940_v18, %v123_v55  ;;  %vm2051_vm9 = vcmp.eq.s32.totalorder %v1940_v18, %v126_v54  ;;  %v212_v54 = vsel %vm1982_vm3, %v2150_v50, 0.0  ;;  %v213_v55 = vsel %vm1991_vm4, %v2152_v51, 0.0 }
  0x8f   :  { %v3353_v58 = vsel %vm2037_vm8, 4294967295, %v3352_v58  ;;  %v169_v61 = vsel %vm2037_vm8, %v2034_v57, 0.0  ;;  %v3356_v62 = vsel %vm2051_vm9, 4294967295, %v3355_v62  ;;  %v170_v5 = vsel %vm2051_vm9, %v2055_v1, 0.0 }
  0x90   :  { %3354 = vst [vmem:[#allocation13_spill] sm:$0xff] %v3353_v58  ;;  %3357 = vst [vmem:[#allocation14_spill] sm:$0xff] %v3356_v62  ;;  %191 = vadd.xlane.f32.xlu0 %v168_v60  ;;  %193 = vadd.xlane.f32.xlu1 %v169_v61  ;;  %v2165_v60 = vunpack.c.l.bf16 %v1487_v52  ;;  %v1488_v61 = vld [vmem:[%s3207_s2 + $0x20] sm:$0xff]  }
  0x91   :  { %v132_v63 = vpop.permute.xlu1 %131  ;;  %v129_v0 = vpop.permute.xlu0 %128  ;;  %v2187_v13 = vunpack.c.h.bf16 %v1488_v61 }
  0x92   :  { %vm2060_vm10 = vcmp.eq.s32.totalorder %v1940_v18, %v129_v0  ;;  %vm2074_vm11 = vcmp.eq.s32.totalorder %v1940_v18, %v132_v63  ;;  %v214_v63 = vsel %vm2005_vm5, %v2163_v59, 0.0  ;;  %v215_v0 = vsel %vm2014_vm6, %v2165_v60, 0.0 }
  0x93   :  { %v3359_v3 = vsel %vm2060_vm10, 4294967295, %v3358_v3  ;;  %v171_v6 = vsel %vm2060_vm10, %v2057_v2, 0.0  ;;  %v3362_v7 = vsel %vm2074_vm11, 4294967295, %v3361_v7  ;;  %v172_v14 = vsel %vm2074_vm11, %v2078_v10, 0.0 }
  0x94   :  { %3360 = vst [vmem:[#allocation15_spill] sm:$0xff] %v3359_v3  ;;  %3363 = vst [vmem:[#allocation16_spill] sm:$0xff] %v3362_v7  ;;  %195 = vadd.xlane.f32.xlu0 %v170_v5  ;;  %197 = vadd.xlane.f32.xlu1 %v171_v6  ;;  %v2178_v5 = vunpack.c.l.bf16 %v1488_v61  ;;  %v216_v6 = vsel %vm2028_vm7, %v2176_v4, 0.0 }
  0x95   :  { %v138_v8 = vpop.permute.xlu1 %137  ;;  %v135_v9 = vpop.permute.xlu0 %134 }
  0x96   :  { %vm2083_vm12 = vcmp.eq.s32.totalorder %v1940_v18, %v135_v9  ;;  %vm2097_vm13 = vcmp.eq.s32.totalorder %v1940_v18, %v138_v8  ;;  %v217_v8 = vsel %vm2037_vm8, %v2178_v5, 0.0  ;;  %v1366_v9 = vadd.f32 -1000.0, %v1948_v23 }
  0x97   :  { %v3365_v12 = vsel %vm2083_vm12, 4294967295, %v3364_v12  ;;  %v173_v15 = vsel %vm2083_vm12, %v2080_v11, 0.0  ;;  %v3368_v16 = vsel %vm2097_vm13, 4294967295, %v3367_v16  ;;  %v174_v28 = vsel %vm2097_vm13, %v2101_v20, 0.0 }
  0x98   :  { %3366 = vst [vmem:[#allocation17_spill] sm:$0xff] %v3365_v12  ;;  %3369 = vst [vmem:[#allocation18_spill] sm:$0xff] %v3368_v16  ;;  %199 = vadd.xlane.f32.xlu0 %v172_v14  ;;  %201 = vadd.xlane.f32.xlu1 %v173_v15  ;;  %v218_v14 = vsel %vm2051_vm9, %v2187_v13, 0.0  ;;  %v2195_v15 = vsel %vm1956_vm1, %v1366_v9, %v1948_v23 }
  0x99   :  { %v144_v17 = vpop.permute.xlu1 %143  ;;  %v141_v19 = vpop.permute.xlu0 %140 }
  0x9a   :  { %vm2106_vm14 = vcmp.eq.s32.totalorder %v1940_v18, %v141_v19  ;;  %vm2120_vm15 = vcmp.eq.s32.totalorder %v1940_v18, %v144_v17  ;;  %v209_v18 = vsel %vm1956_vm1, %v2126_v34, 0.0  ;;  %v1367_v17 = vadd.f32 -1000.0, %v1968_v31 }
  0x9b   :  { %v3371_v22 = vsel %vm2106_vm14, 4294967295, %v3370_v22  ;;  %v175_v29 = vsel %vm2106_vm14, %v2103_v21, 0.0  ;;  %v3374_v30 = vsel %vm2120_vm15, 4294967295, %v3373_v30  ;;  %v176_v37 = vsel %vm2120_vm15, %v2124_v33, 0.0 }
  0x9c   :  { %3372 = vst [vmem:[#allocation19_spill] sm:$0xff] %v3371_v22  ;;  %3375 = vst [vmem:[#allocation20_spill] sm:$0xff] %v3374_v30  ;;  %203 = vadd.xlane.f32.xlu0 %v174_v28  ;;  %205 = vadd.xlane.f32.xlu1 %v175_v29  ;;  %v1350_v19 = vadd.f32 -1000.0, %v2126_v34  ;;  %v2203_v26 = vsel %vm1971_vm2, %v1367_v17, %v1968_v31  ;;  %v1351_v29 = vadd.f32 -1000.0, %v2137_v41  ;;  %v1372_v17 = vadd.f32 -1000.0, %v2011_v48 }
  0x9e   :  { %v2208_v28 = vsel %vm1956_vm1, %v1350_v19, %v2126_v34 }
  0xa0   :  { %207 = vadd.xlane.f32.xlu0 %v176_v37  ;;  %225 = vadd.xlane.f32.xlu1 %v209_v18  ;;  %v2217_v37 = vsel %vm1971_vm2, %v1351_v29, %v2137_v41  ;;  %v2222_v18 = vsel %vm1951_vm0, %v1368_v36, %v1963_v27  ;;  %v2278_v29 = vsel %vm2014_vm6, %v1372_v17, %v2011_v48  ;;  %v1356_v36 = vadd.f32 -1000.0, %v2165_v60 }
  0xa1   :  { %v1358_v17 = vadd.f32 -1000.0, %v2178_v5 }
  0xa3   :  { %v2319_v53 = vsel %vm2037_vm8, %v1358_v17, %v2178_v5 }
  0xa4   :  { %227 = vadd.xlane.f32.xlu0 %v210_v45  ;;  %229 = vadd.xlane.f32.xlu1 %v211_v46  ;;  %v1369_v45 = vadd.f32 -1000.0, %v1986_v38  ;;  %v2231_v46 = vsel %vm1951_vm0, %v1352_v43, %v2139_v42  ;;  %v1373_v43 = vadd.f32 -1000.0, %v2032_v56  ;;  %3377 = vst [vmem:[#allocation22_spill] sm:$0xff] %v2319_v53 }
  0xa6   :  { %v2236_v52 = vsel %vm1982_vm3, %v1369_v45, %v1986_v38  ;;  %v2287_v45 = vsel %vm2014_vm6, %v1356_v36, %v2165_v60  ;;  %v1375_v36 = vadd.f32 -1000.0, %v2055_v1 }
  0xa8   :  { %231 = vadd.xlane.f32.xlu0 %v212_v54  ;;  %233 = vadd.xlane.f32.xlu1 %v213_v55  ;;  %v1353_v54 = vadd.f32 -1000.0, %v2150_v50  ;;  %v1370_v55 = vadd.f32 -1000.0, %v1988_v39 }
  0xaa   :  { %v2245_v61 = vsel %vm1982_vm3, %v1353_v54, %v2150_v50  ;;  %v2292_v54 = vsel %vm2028_vm7, %v1373_v43, %v2032_v56  ;;  %v1489_v43 = vld [vmem:[%s3207_s2 + $0x28] sm:$0xff]  }
  0xab   :  { %v2327_v44 = vunpack.c.l.bf16 %v1489_v43  ;;  %v2331_v40 = vunpack.c.h.bf16 %v1489_v43  ;;  %v1490_v43 = vld [vmem:[%s3207_s2 + $0x30] sm:$0xff]  }
  0xac   :  { %235 = vadd.xlane.f32.xlu0 %v214_v63  ;;  %237 = vadd.xlane.f32.xlu1 %v215_v0  ;;  %v2250_v63 = vsel %vm1991_vm4, %v1370_v55, %v1988_v39  ;;  %v1354_v0 = vadd.f32 -1000.0, %v2152_v51  ;;  %v1357_v55 = vadd.f32 -1000.0, %v2176_v4  ;;  %v2362_v32 = vunpack.c.l.bf16 %v1490_v43 }
  0xad   :  { %v1360_v58 = vadd.f32 -1000.0, %v2327_v44  ;;  %v2366_v25 = vunpack.c.h.bf16 %v1490_v43  ;;  %v1491_v43 = vld [vmem:[%s3207_s2 + $0x38] sm:$0xff]   ;;  %s1871_s2 = smov [#allocation2]  }
  0xae   :  { %s1342_s20 = sshll.u32 %s1871_s2, 4  ;;  %s1343_s20 = int_to_ptr.vmem [resolvable:$true] %s1342_s20 }
  0xaf   :  { %v2354_v62 = vsel %vm2060_vm10, %v1360_v58, %v2327_v44  ;;  %s1848_s0 = scalar_lea.vmem %s1343_s20, 16  ;;  %s1852_s21 = scalar_lea.vmem %s1343_s20, 32 }
  0xb0   :  { %239 = vadd.xlane.f32.xlu0 %v216_v6  ;;  %241 = vadd.xlane.f32.xlu1 %v217_v8  ;;  %v1371_v6 = vadd.f32 -1000.0, %v2009_v47  ;;  %v2259_v8 = vsel %vm1991_vm4, %v1354_v0, %v2152_v51  ;;  %v1374_v0 = vadd.f32 -1000.0, %v2034_v57  ;;  %3381 = vst [vmem:[#allocation26_spill] sm:$0xff] %v2354_v62  ;;  %p1849_p0 = scmp.ne.s32.totalorder %s1343_s20, %s1848_s0  ;;  %p1853_p1 = scmp.lt.s32.totalorder %s1343_s20, %s1343_s20 }
  0xb1   :  { %p1854_p2 = scmp.lt.s32.totalorder %s1852_s21, %s1848_s0 }
  0xb2   :  { %v2264_v9 = vsel %vm2005_vm5, %v1371_v6, %v2009_v47  ;;  %v2301_v6 = vsel %vm2028_vm7, %v1357_v55, %v2176_v4  ;;  %v1359_v55 = vadd.f32 -1000.0, %v2187_v13 }
  0xb3   :  { %p1855_p3 = por %p1854_p2, %p1853_p1 }
  0xb4   :  { %243 = vadd.xlane.f32.xlu0 %v218_v14  ;;  %961 = vmax.xlane.f32.xlu1 %v2195_v15  ;;  %v1355_v14 = vadd.f32 -1000.0, %v2163_v59  ;;  %v2336_v17 = vsel %vm2051_vm9, %v1359_v55, %v2187_v13  ;;  %v1361_v55 = vadd.f32 -1000.0, %v2331_v40 }
  0xb5   :  { %3379 = vst [vmem:[#allocation24_spill] sm:$0xff] %v2336_v17  ;;  %p1856_p4 = pnand %p1855_p3, %p1849_p0 }
  0xb6   :  { %v2273_v19 = vsel %vm2005_vm5, %v1355_v14, %v2163_v59  ;;  %v2306_v14 = vsel %vm2037_vm8, %v1374_v0, %v2034_v57  ;;  %v2324_v0 = vsel %vm2051_vm9, %v1375_v36, %v2055_v1  ;;  %v2341_v36 = vsel %vm2060_vm10, %v1376_v49, %v2057_v2 }
  0xb7   :  { %3378 = vst [vmem:[#allocation23_spill] sm:$0xff] %v2324_v0  ;;  %3380 = vst [vmem:[#allocation25_spill] sm:$0xff] %v2341_v36  ;;  %v2359_v49 = vsel %vm2074_vm11, %v1377_v35, %v2078_v10  ;;  %v2371_v58 = vsel %vm2074_vm11, %v1361_v55, %v2331_v40  ;;  %v2376_v35 = vsel %vm2083_vm12, %v1378_v24, %v2080_v11  ;;  %v1363_v55 = vadd.f32 -1000.0, %v2366_v25 }
  0xb8   :  { %963 = vmax.xlane.f32.xlu0 %v2203_v26  ;;  %721 = vmax.xlane.f32.xlu1 %v2208_v28  ;;  %3382 = vst [vmem:[#allocation27_spill] sm:$0xff] %v2359_v49  ;;  %3383 = vst [vmem:[#allocation28_spill] sm:$0xff] %v2371_v58 }
  0xb9   :  { %3384 = vst [vmem:[#allocation29_spill] sm:$0xff] %v2376_v35 }
  0xbc   :  { %723 = vmax.xlane.f32.xlu0 %v2217_v37  ;;  %965 = vmax.xlane.f32.xlu1 %v2222_v18 }
  0xc0   :  { %725 = vmax.xlane.f32.xlu0 %v2231_v46  ;;  %967 = vmax.xlane.f32.xlu1 %v2236_v52 }
  0xc4   :  { %727 = vmax.xlane.f32.xlu0 %v2245_v61  ;;  %969 = vmax.xlane.f32.xlu1 %v2250_v63 }
  0xc8   :  { %729 = vmax.xlane.f32.xlu0 %v2259_v8  ;;  %971 = vmax.xlane.f32.xlu1 %v2264_v9 }
  0xcc   :  { %731 = vmax.xlane.f32.xlu0 %v2273_v19  ;;  %973 = vmax.xlane.f32.xlu1 %v2278_v29 }
  0xd0   :  { %733 = vmax.xlane.f32.xlu0 %v2287_v45  ;;  %975 = vmax.xlane.f32.xlu1 %v2292_v54 }
  0xd4   :  { %735 = vmax.xlane.f32.xlu0 %v2301_v6  ;;  %977 = vmax.xlane.f32.xlu1 %v2306_v14 }
  0xd8   :  { %737 = vmax.xlane.f32.xlu0 %v2319_v53  ;;  %979 = vmax.xlane.f32.xlu1 %v2324_v0  ;;  %v1381_v0 = vadd.f32 -1000.0, %v2124_v33 }
  0xdc   :  { %739 = vmax.xlane.f32.xlu0 %v2336_v17  ;;  %981 = vmax.xlane.f32.xlu1 %v2341_v36  ;;  %v1362_v36 = vadd.f32 -1000.0, %v2362_v32  ;;  %v1379_v17 = vadd.f32 -1000.0, %v2101_v20 }
  0xde   :  { %v2394_v24 = vsel %vm2097_vm13, %v1379_v17, %v2101_v20 }
  0xe0   :  { %741 = vmax.xlane.f32.xlu0 %v2354_v62  ;;  %983 = vmax.xlane.f32.xlu1 %v2359_v49  ;;  %v2389_v49 = vsel %vm2083_vm12, %v1362_v36, %v2362_v32  ;;  %v2397_v62 = vunpack.c.l.bf16 %v1491_v43  ;;  %v2406_v36 = vsel %vm2097_vm13, %v1363_v55, %v2366_v25  ;;  %v2425_v55 = vsel %vm2120_vm15, %v1381_v0, %v2124_v33 }
  0xe1   :  { %3388 = vst [vmem:[#allocation33_spill] sm:$0xff] %v2425_v55  ;;  %v220_v0 = vsel %vm2074_vm11, %v2331_v40, 0.0 }
  0xe2   :  { %3385 = vst [vmem:[#allocation30_spill] sm:$0xff] %v2397_v62  ;;  %v1364_v53 = vadd.f32 -1000.0, %v2397_v62  ;;  %v223_v3 = vsel %vm2106_vm14, %v2397_v62, 0.0 }
  0xe4   :  { %743 = vmax.xlane.f32.xlu0 %v2371_v58  ;;  %985 = vmax.xlane.f32.xlu1 %v2376_v35  ;;  %v1380_v58 = vadd.f32 -1000.0, %v2103_v21  ;;  %v2401_v35 = vunpack.c.h.bf16 %v1491_v43  ;;  %v2420_v43 = vsel %vm2106_vm14, %v1364_v53, %v2397_v62  ;;  %v219_v53 = vsel %vm2060_vm10, %v2327_v44, 0.0 }
  0xe6   :  { %3386 = vst [vmem:[#allocation31_spill] sm:$0xff] %v2401_v35  ;;  %v2411_v17 = vsel %vm2106_vm14, %v1380_v58, %v2103_v21  ;;  %v1365_v58 = vadd.f32 -1000.0, %v2401_v35 }
  0xe7   :  { %3387 = vst [vmem:[#allocation32_spill] sm:$0xff] %v2411_v17 }
  0xe8   :  { %745 = vmax.xlane.f32.xlu0 %v2389_v49  ;;  %987 = vmax.xlane.f32.xlu1 %v2394_v24 }
  0xec   :  { %747 = vmax.xlane.f32.xlu0 %v2406_v36  ;;  %989 = vmax.xlane.f32.xlu1 %v2411_v17  ;;  %v2433_v17 = vsel %vm2120_vm15, %v1365_v58, %v2401_v35  ;;  %v222_v58 = vsel %vm2097_vm13, %v2366_v25, 0.0 }
  0xf0   :  { %749 = vmax.xlane.f32.xlu0 %v2420_v43  ;;  %991 = vmax.xlane.f32.xlu1 %v2425_v55  ;;  %v221_v55 = vsel %vm2083_vm12, %v2362_v32, 0.0 }
  0xf4   :  { %751 = vmax.xlane.f32.xlu0 %v2433_v17  ;;  %245 = vadd.xlane.f32.xlu1 %v219_v53  ;;  %v224_v53 = vsel %vm2120_vm15, %v2401_v35, 0.0 }
  0xf8   :  { %247 = vadd.xlane.f32.xlu0 %v220_v0  ;;  %249 = vadd.xlane.f32.xlu1 %v221_v55 }
  0xfc   :  { %251 = vadd.xlane.f32.xlu0 %v222_v58  ;;  %253 = vadd.xlane.f32.xlu1 %v223_v3 }
 0x100   :  { %255 = vadd.xlane.f32.xlu0 %v224_v53  ;;  %257 = vmax.xlane.f32.xlu1 %v1948_v23 }
 0x104   :  { %259 = vmax.xlane.f32.xlu0 %v1968_v31  ;;  %261 = vmax.xlane.f32.xlu1 %v1963_v27 }
 0x108   :  { %433 = vmax.xlane.f32.xlu0 %v2126_v34  ;;  %435 = vmax.xlane.f32.xlu1 %v2137_v41 }
 0x109   :  { %v2459_v55 = vpop.xlane.xlu0 %177 }
 0x10a   :  { %3389 = vst [vmem:[#allocation34_spill] sm:$0xff] %v2459_v55 }
 0x10c   :  { %263 = vmax.xlane.f32.xlu0 %v1986_v38  ;;  %437 = vmax.xlane.f32.xlu1 %v2139_v42 }
 0x10d   :  { %v2463_v3 = vpop.xlane.xlu1 %179  ;;  %v2465_v0 = vpop.xlane.xlu0 %181 }
 0x10e   :  { %3390 = vst [vmem:[#allocation35_spill] sm:$0xff] %v2463_v3  ;;  %3391 = vst [vmem:[#allocation36_spill] sm:$0xff] %v2465_v0 }
 0x110   :  { %265 = vmax.xlane.f32.xlu0 %v1988_v39  ;;  %439 = vmax.xlane.f32.xlu1 %v2150_v50 }
 0x111   :  { %v2469_v58 = vpop.xlane.xlu1 %185  ;;  %v2471_v53 = vpop.xlane.xlu0 %183 }
 0x112   :  { %3392 = vst [vmem:[#allocation37_spill] sm:$0xff] %v2469_v58  ;;  %3393 = vst [vmem:[#allocation38_spill] sm:$0xff] %v2471_v53 }
 0x114   :  { %267 = vmax.xlane.f32.xlu0 %v2009_v47  ;;  %441 = vmax.xlane.f32.xlu1 %v2152_v51 }
 0x115   :  { %v2475_v30 = vpop.xlane.xlu1 %189  ;;  %v2477_v22 = vpop.xlane.xlu0 %187 }
 0x116   :  { %3394 = vst [vmem:[#allocation39_spill] sm:$0xff] %v2475_v30  ;;  %3395 = vst [vmem:[#allocation40_spill] sm:$0xff] %v2477_v22 }
 0x118   :  { %269 = vmax.xlane.f32.xlu0 %v2011_v48  ;;  %443 = vmax.xlane.f32.xlu1 %v2163_v59 }
 0x119   :  { %v2481_v16 = vpop.xlane.xlu1 %193  ;;  %v2483_v12 = vpop.xlane.xlu0 %191 }
 0x11a   :  { %3396 = vst [vmem:[#allocation41_spill] sm:$0xff] %v2481_v16  ;;  %3397 = vst [vmem:[#allocation42_spill] sm:$0xff] %v2483_v12 }
 0x11c   :  { %271 = vmax.xlane.f32.xlu0 %v2032_v56  ;;  %445 = vmax.xlane.f32.xlu1 %v2165_v60 }
 0x11d   :  { %v2487_v7 = vpop.xlane.xlu1 %197  ;;  %v2489_v58 = vpop.xlane.xlu0 %195 }
 0x11e   :  { %3398 = vst [vmem:[#allocation43_spill] sm:$0xff] %v2487_v7  ;;  %3399 = vst [vmem:[#allocation44_spill] sm:$0xff] %v2489_v58 }
 0x120   :  { %273 = vmax.xlane.f32.xlu0 %v2034_v57  ;;  %447 = vmax.xlane.f32.xlu1 %v2176_v4 }
 0x121   :  { %v2493_v30 = vpop.xlane.xlu1 %201  ;;  %v2495_v22 = vpop.xlane.xlu0 %199 }
 0x122   :  { %3400 = vst [vmem:[#allocation45_spill] sm:$0xff] %v2493_v30  ;;  %3401 = vst [vmem:[#allocation46_spill] sm:$0xff] %v2495_v22 }
 0x124   :  { %449 = vmax.xlane.f32.xlu0 %v2178_v5  ;;  %275 = vmax.xlane.f32.xlu1 %v2055_v1 }
 0x125   :  { %v2499_v16 = vpop.xlane.xlu1 %205  ;;  %v2501_v12 = vpop.xlane.xlu0 %203 }
 0x126   :  { %3402 = vst [vmem:[#allocation47_spill] sm:$0xff] %v2499_v16  ;;  %3403 = vst [vmem:[#allocation48_spill] sm:$0xff] %v2501_v12 }
 0x128   :  { %451 = vmax.xlane.f32.xlu0 %v2187_v13  ;;  %277 = vmax.xlane.f32.xlu1 %v2057_v2 }
 0x129   :  { %v2505_v7 = vpop.xlane.xlu1 %225  ;;  %v2507_v58 = vpop.xlane.xlu0 %207 }
 0x12a   :  { %3404 = vst [vmem:[#allocation49_spill] sm:$0xff] %v2505_v7  ;;  %3405 = vst [vmem:[#allocation50_spill] sm:$0xff] %v2507_v58 }
 0x12c   :  { %453 = vmax.xlane.f32.xlu0 %v2327_v44  ;;  %279 = vmax.xlane.f32.xlu1 %v2078_v10 }
 0x12d   :  { %v2511_v30 = vpop.xlane.xlu1 %229  ;;  %v2513_v22 = vpop.xlane.xlu0 %227 }
 0x12e   :  { %3406 = vst [vmem:[#allocation51_spill] sm:$0xff] %v2511_v30  ;;  %3407 = vst [vmem:[#allocation52_spill] sm:$0xff] %v2513_v22 }
 0x130   :  { %455 = vmax.xlane.f32.xlu0 %v2331_v40  ;;  %281 = vmax.xlane.f32.xlu1 %v2080_v11 }
 0x131   :  { %v2517_v16 = vpop.xlane.xlu1 %233  ;;  %v2519_v12 = vpop.xlane.xlu0 %231 }
 0x132   :  { %3408 = vst [vmem:[#allocation53_spill] sm:$0xff] %v2517_v16  ;;  %3409 = vst [vmem:[#allocation54_spill] sm:$0xff] %v2519_v12 }
 0x134   :  { %457 = vmax.xlane.f32.xlu0 %v2362_v32  ;;  %283 = vmax.xlane.f32.xlu1 %v2101_v20 }
 0x135   :  { %v2523_v58 = vpop.xlane.xlu1 %237  ;;  %v2525_v53 = vpop.xlane.xlu0 %235 }
 0x136   :  { %3410 = vst [vmem:[#allocation55_spill] sm:$0xff] %v2523_v58  ;;  %3411 = vst [vmem:[#allocation56_spill] sm:$0xff] %v2525_v53 }
 0x138   :  { %459 = vmax.xlane.f32.xlu0 %v2366_v25  ;;  %285 = vmax.xlane.f32.xlu1 %v2103_v21 }
 0x139   :  { %v2529_v30 = vpop.xlane.xlu1 %241  ;;  %v2531_v22 = vpop.xlane.xlu0 %239 }
 0x13a   :  { %3412 = vst [vmem:[#allocation57_spill] sm:$0xff] %v2529_v30  ;;  %3413 = vst [vmem:[#allocation58_spill] sm:$0xff] %v2531_v22 }
 0x13c   :  { %461 = vmax.xlane.f32.xlu0 %v2397_v62  ;;  %287 = vmax.xlane.f32.xlu1 %v2124_v33 }
 0x13d   :  { %v2535_v16 = vpop.xlane.xlu1 %961  ;;  %v2537_v12 = vpop.xlane.xlu0 %243 }
 0x13e   :  { %3414 = vst [vmem:[#allocation59_spill] sm:$0xff] %v2537_v12  ;;  %v2541_v58 = vsub.f32 %v2195_v15, %v2535_v16 }
 0x140   :  { %3415 = vst [vmem:[#allocation60_spill] sm:$0xff] %v2541_v58  ;;  %v1009_v53 = vmul.f32 1.442695, %v2541_v58 }
 0x141   :  { %v2544_v0 = vpop.xlane.xlu1 %721  ;;  %v2546_v3 = vpop.xlane.xlu0 %963 }
 0x142   :  { %3416 = vst [vmem:[#allocation61_spill] sm:$0xff] %v2546_v3  ;;  %1496 = vpow2.f32 %v1009_v53  ;;  %v753_v30 = vsub.f32 %v2208_v28, %v2544_v0  ;;  %v2552_v22 = vsub.f32 %v2203_v26, %v2546_v3 }
 0x144   :  { %3417 = vst [vmem:[#allocation62_spill] sm:$0xff] %v2552_v22  ;;  %v769_v62 = vmul.f32 1.442695, %v753_v30  ;;  %v1011_v12 = vmul.f32 1.442695, %v2552_v22 }
 0x145   :  { %v2555_v33 = vpop.xlane.xlu1 %965  ;;  %v2557_v15 = vpop.xlane.xlu0 %723 }
 0x146   :  { %1498 = vpow2.f32 %v769_v62  ;;  %v2561_v58 = vsub.f32 %v2222_v18, %v2555_v33  ;;  %v754_v53 = vsub.f32 %v2217_v37, %v2557_v15 }
 0x147   :  { %1500 = vpow2.f32 %v1011_v12 }
 0x148   :  { %3418 = vst [vmem:[#allocation63_spill] sm:$0xff] %v2561_v58  ;;  %v1013_v28 = vmul.f32 1.442695, %v2561_v58  ;;  %v771_v26 = vmul.f32 1.442695, %v754_v53 }
 0x149   :  { %v2566_v3 = vpop.xlane.xlu1 %967  ;;  %v2568_v30 = vpop.xlane.xlu0 %725 }
 0x14a   :  { %1502 = vpow2.f32 %v1013_v28  ;;  %v2572_v22 = vsub.f32 %v2236_v52, %v2566_v3  ;;  %v755_v62 = vsub.f32 %v2231_v46, %v2568_v30 }
 0x14b   :  { %1504 = vpow2.f32 %v771_v26 }
 0x14c   :  { %3419 = vst [vmem:[#allocation64_spill] sm:$0xff] %v2572_v22  ;;  %v1015_v18 = vmul.f32 1.442695, %v2572_v22  ;;  %v773_v37 = vmul.f32 1.442695, %v755_v62 }
 0x14d   :  { %v2577_v12 = vpop.xlane.xlu1 %969  ;;  %v2579_v58 = vpop.xlane.xlu0 %727 }
 0x14e   :  { %3420 = vst [vmem:[#allocation65_spill] sm:$0xff] %v2577_v12  ;;  %1506 = vpow2.f32 %v1015_v18  ;;  %v2583_v53 = vsub.f32 %v2250_v63, %v2577_v12  ;;  %v756_v52 = vsub.f32 %v2245_v61, %v2579_v58 }
 0x14f   :  { %v1497_v28 = vpop.eup %1496  ;;  %1508 = vpow2.f32 %v773_v37 }
 0x150   :  { %3421 = vst [vmem:[#allocation66_spill] sm:$0xff] %v2583_v53  ;;  %v1017_v46 = vmul.f32 1.442695, %v2583_v53  ;;  %v775_v26 = vmul.f32 1.442695, %v756_v52  ;;  %1105 = vadd.xlane.f32.xlu0 %v1497_v28 }
 0x151   :  { %v2588_v22 = vpop.xlane.xlu1 %971  ;;  %v2590_v62 = vpop.xlane.xlu0 %729 }
 0x152   :  { %3422 = vst [vmem:[#allocation67_spill] sm:$0xff] %v2590_v62  ;;  %1510 = vpow2.f32 %v1017_v46  ;;  %v2594_v18 = vsub.f32 %v2264_v9, %v2588_v22  ;;  %v757_v63 = vsub.f32 %v2259_v8, %v2590_v62 }
 0x153   :  { %v2598_v12 = vpop.eup %1498  ;;  %1512 = vpow2.f32 %v775_v26 }
 0x154   :  { %3423 = vst [vmem:[#allocation68_spill] sm:$0xff] %v2594_v18  ;;  %3424 = vst [vmem:[#allocation69_spill] sm:$0xff] %v2598_v12  ;;  %v1019_v61 = vmul.f32 1.442695, %v2594_v18  ;;  %v777_v37 = vmul.f32 1.442695, %v757_v63  ;;  %865 = vadd.xlane.f32.xlu0 %v2598_v12  ;;  %v1501_v52 = vpop.eup %1500 }
 0x155   :  { %v2602_v28 = vpop.xlane.xlu1 %973  ;;  %v2604_v53 = vpop.xlane.xlu0 %731  ;;  %1107 = vadd.xlane.f32.xlu1 %v1501_v52 }
 0x156   :  { %1514 = vpow2.f32 %v1019_v61  ;;  %v2608_v9 = vsub.f32 %v2278_v29, %v2602_v28  ;;  %v758_v8 = vsub.f32 %v2273_v19, %v2604_v53 }
 0x157   :  { %v1503_v46 = vpop.eup %1502  ;;  %1516 = vpow2.f32 %v777_v37 }
 0x158   :  { %3425 = vst [vmem:[#allocation70_spill] sm:$0xff] %v2608_v9  ;;  %v1021_v26 = vmul.f32 1.442695, %v2608_v9  ;;  %v779_v63 = vmul.f32 1.442695, %v758_v8  ;;  %1109 = vadd.xlane.f32.xlu0 %v1503_v46  ;;  %v2613_v18 = vpop.eup %1504 }
 0x159   :  { %3426 = vst [vmem:[#allocation71_spill] sm:$0xff] %v2613_v18  ;;  %v2615_v12 = vpop.xlane.xlu1 %975  ;;  %v2617_v62 = vpop.xlane.xlu0 %733  ;;  %867 = vadd.xlane.f32.xlu1 %v2613_v18 }
 0x15a   :  { %3427 = vst [vmem:[#allocation72_spill] sm:$0xff] %v2617_v62  ;;  %1518 = vpow2.f32 %v1021_v26  ;;  %v2622_v29 = vsub.f32 %v2292_v54, %v2615_v12  ;;  %v759_v19 = vsub.f32 %v2287_v45, %v2617_v62 }
 0x15b   :  { %v1507_v61 = vpop.eup %1506  ;;  %1520 = vpow2.f32 %v779_v63 }
 0x15c   :  { %3428 = vst [vmem:[#allocation73_spill] sm:$0xff] %v2622_v29  ;;  %v1023_v37 = vmul.f32 1.442695, %v2622_v29  ;;  %v781_v52 = vmul.f32 1.442695, %v759_v19  ;;  %1111 = vadd.xlane.f32.xlu0 %v1507_v61  ;;  %v2627_v8 = vpop.eup %1508 }
 0x15d   :  { %3429 = vst [vmem:[#allocation74_spill] sm:$0xff] %v2627_v8  ;;  %v2629_v46 = vpop.xlane.xlu1 %977  ;;  %v2631_v26 = vpop.xlane.xlu0 %735  ;;  %869 = vadd.xlane.f32.xlu1 %v2627_v8 }
 0x15e   :  { %3430 = vst [vmem:[#allocation75_spill] sm:$0xff] %v2629_v46  ;;  %3431 = vst [vmem:[#allocation76_spill] sm:$0xff] %v2631_v26  ;;  %1522 = vpow2.f32 %v1023_v37  ;;  %v2636_v54 = vsub.f32 %v2306_v14, %v2629_v46  ;;  %v760_v45 = vsub.f32 %v2301_v6, %v2631_v26  ;;  %v3436_v14 = vld [vmem:[#allocation23_spill] sm:$0xff]  ;;  %v3438_v6 = vld [vmem:[#allocation22_spill] sm:$0xff] }
 0x15f   :  { %v1511_v63 = vpop.eup %1510  ;;  %1524 = vpow2.f32 %v781_v52 }
 0x160   :  { %3432 = vst [vmem:[#allocation77_spill] sm:$0xff] %v2636_v54  ;;  %v1025_v19 = vmul.f32 1.442695, %v2636_v54  ;;  %v783_v61 = vmul.f32 1.442695, %v760_v45  ;;  %1113 = vadd.xlane.f32.xlu0 %v1511_v63  ;;  %v2641_v29 = vpop.eup %1512 }
 0x161   :  { %3433 = vst [vmem:[#allocation78_spill] sm:$0xff] %v2641_v29  ;;  %v2643_v9 = vpop.xlane.xlu1 %979  ;;  %v2645_v37 = vpop.xlane.xlu0 %737  ;;  %871 = vadd.xlane.f32.xlu1 %v2641_v29 }
 0x162   :  { %3434 = vst [vmem:[#allocation79_spill] sm:$0xff] %v2643_v9  ;;  %3435 = vst [vmem:[#allocation80_spill] sm:$0xff] %v2645_v37  ;;  %1526 = vpow2.f32 %v1025_v19  ;;  %v2650_v8 = vsub.f32 %v3436_v14, %v2643_v9  ;;  %v761_v52 = vsub.f32 %v3438_v6, %v2645_v37  ;;  %v3442_v14 = vld [vmem:[#allocation24_spill] sm:$0xff]  ;;  %v3443_v6 = vld [vmem:[#allocation25_spill] sm:$0xff] }
 0x163   :  { %v1515_v18 = vpop.eup %1514  ;;  %1528 = vpow2.f32 %v783_v61 }
 0x164   :  { %3437 = vst [vmem:[#allocation23_spill] sm:$0xff] %v2650_v8  ;;  %v1027_v45 = vmul.f32 1.442695, %v2650_v8  ;;  %v785_v63 = vmul.f32 1.442695, %v761_v52  ;;  %1115 = vadd.xlane.f32.xlu0 %v1515_v18  ;;  %v2655_v54 = vpop.eup %1516 }
 0x165   :  { %3439 = vst [vmem:[#allocation22_spill] sm:$0xff] %v2655_v54  ;;  %v2657_v26 = vpop.xlane.xlu1 %981  ;;  %v2659_v19 = vpop.xlane.xlu0 %739  ;;  %873 = vadd.xlane.f32.xlu1 %v2655_v54 }
 0x166   :  { %3440 = vst [vmem:[#allocation81_spill] sm:$0xff] %v2657_v26  ;;  %3441 = vst [vmem:[#allocation82_spill] sm:$0xff] %v2659_v19  ;;  %1530 = vpow2.f32 %v1027_v45  ;;  %v762_v29 = vsub.f32 %v3442_v14, %v2659_v19  ;;  %v2666_v61 = vsub.f32 %v3443_v6, %v2657_v26  ;;  %v3448_v45 = vld [vmem:[#allocation26_spill] sm:$0xff]  ;;  %v3449_v6 = vld [vmem:[#allocation27_spill] sm:$0xff] }
 0x167   :  { %v1519_v9 = vpop.eup %1518  ;;  %1532 = vpow2.f32 %v785_v63 }
 0x168   :  { %3444 = vst [vmem:[#allocation24_spill] sm:$0xff] %v2666_v61  ;;  %v787_v52 = vmul.f32 1.442695, %v762_v29  ;;  %1117 = vadd.xlane.f32.xlu0 %v1519_v9  ;;  %v2668_v18 = vpop.eup %1520  ;;  %v1029_v19 = vmul.f32 1.442695, %v2666_v61 }
 0x169   :  { %3445 = vst [vmem:[#allocation25_spill] sm:$0xff] %v2668_v18  ;;  %v2670_v8 = vpop.xlane.xlu1 %983  ;;  %v2672_v37 = vpop.xlane.xlu0 %741  ;;  %875 = vadd.xlane.f32.xlu1 %v2668_v18 }
 0x16a   :  { %3446 = vst [vmem:[#allocation83_spill] sm:$0xff] %v2670_v8  ;;  %3447 = vst [vmem:[#allocation84_spill] sm:$0xff] %v2672_v37  ;;  %v763_v54 = vsub.f32 %v3448_v45, %v2672_v37  ;;  %v2680_v26 = vsub.f32 %v3449_v6, %v2670_v8  ;;  %1534 = vpow2.f32 %v787_v52  ;;  %v3452_v45 = vld [vmem:[#allocation28_spill] sm:$0xff]  ;;  %v3453_v6 = vld [vmem:[#allocation29_spill] sm:$0xff] }
 0x16b   :  { %v1523_v14 = vpop.eup %1522  ;;  %1536 = vpow2.f32 %v1029_v19 }
 0x16c   :  { %3450 = vst [vmem:[#allocation26_spill] sm:$0xff] %v2680_v26  ;;  %v789_v9 = vmul.f32 1.442695, %v763_v54  ;;  %1119 = vadd.xlane.f32.xlu0 %v1523_v14  ;;  %v2682_v29 = vpop.eup %1524  ;;  %v1031_v61 = vmul.f32 1.442695, %v2680_v26 }
 0x16d   :  { %3451 = vst [vmem:[#allocation27_spill] sm:$0xff] %v2682_v29  ;;  %v2684_v63 = vpop.xlane.xlu1 %985  ;;  %v2686_v46 = vpop.xlane.xlu0 %743  ;;  %877 = vadd.xlane.f32.xlu1 %v2682_v29 }
 0x16e   :  { %v764_v18 = vsub.f32 %v3452_v45, %v2686_v46  ;;  %v2694_v52 = vsub.f32 %v3453_v6, %v2684_v63  ;;  %1538 = vpow2.f32 %v789_v9 }
 0x16f   :  { %v1527_v37 = vpop.eup %1526  ;;  %1540 = vpow2.f32 %v1031_v61 }
 0x170   :  { %3454 = vst [vmem:[#allocation28_spill] sm:$0xff] %v2694_v52  ;;  %v791_v54 = vmul.f32 1.442695, %v764_v18  ;;  %1121 = vadd.xlane.f32.xlu0 %v1527_v37  ;;  %v2696_v14 = vpop.eup %1528  ;;  %v1033_v26 = vmul.f32 1.442695, %v2694_v52 }
 0x171   :  { %3455 = vst [vmem:[#allocation29_spill] sm:$0xff] %v2696_v14  ;;  %v2698_v8 = vpop.xlane.xlu1 %987  ;;  %v2700_v62 = vpop.xlane.xlu0 %745  ;;  %879 = vadd.xlane.f32.xlu1 %v2696_v14 }
 0x172   :  { %v765_v19 = vsub.f32 %v2389_v49, %v2700_v62  ;;  %v2708_v9 = vsub.f32 %v2394_v24, %v2698_v8  ;;  %1542 = vpow2.f32 %v791_v54  ;;  %v3459_v24 = vld [vmem:[#allocation32_spill] sm:$0xff] }
 0x173   :  { %v1531_v45 = vpop.eup %1530  ;;  %1544 = vpow2.f32 %v1033_v26 }
 0x174   :  { %3456 = vst [vmem:[#allocation85_spill] sm:$0xff] %v2708_v9  ;;  %v793_v37 = vmul.f32 1.442695, %v765_v19  ;;  %1123 = vadd.xlane.f32.xlu0 %v1531_v45  ;;  %v2710_v18 = vpop.eup %1532  ;;  %v1035_v61 = vmul.f32 1.442695, %v2708_v9 }
 0x175   :  { %3457 = vst [vmem:[#allocation86_spill] sm:$0xff] %v2710_v18  ;;  %v2712_v6 = vpop.xlane.xlu1 %989  ;;  %v2714_v29 = vpop.xlane.xlu0 %747  ;;  %881 = vadd.xlane.f32.xlu1 %v2710_v18 }
 0x176   :  { %3458 = vst [vmem:[#allocation87_spill] sm:$0xff] %v2714_v29  ;;  %v766_v49 = vsub.f32 %v2406_v36, %v2714_v29  ;;  %v2722_v52 = vsub.f32 %v3459_v24, %v2712_v6  ;;  %1546 = vpow2.f32 %v793_v37  ;;  %v3464_v37 = vld [vmem:[#allocation33_spill] sm:$0xff] }
 0x177   :  { %v2724_v19 = vpop.eup %1534  ;;  %1548 = vpow2.f32 %v1035_v61 }
 0x178   :  { %3460 = vst [vmem:[#allocation32_spill] sm:$0xff] %v2722_v52  ;;  %v795_v54 = vmul.f32 1.442695, %v766_v49  ;;  %3461 = vst [vmem:[#allocation88_spill] sm:$0xff] %v2724_v19  ;;  %883 = vadd.xlane.f32.xlu0 %v2724_v19  ;;  %v1037_v26 = vmul.f32 1.442695, %v2722_v52  ;;  %v1537_v24 = vpop.eup %1536 }
 0x179   :  { %v2726_v45 = vpop.xlane.xlu1 %991  ;;  %v2728_v14 = vpop.xlane.xlu0 %749  ;;  %463 = vmax.xlane.f32.xlu1 %v2401_v35 }
 0x17a   :  { %3462 = vst [vmem:[#allocation89_spill] sm:$0xff] %v2726_v45  ;;  %3463 = vst [vmem:[#allocation90_spill] sm:$0xff] %v2728_v14  ;;  %v767_v36 = vsub.f32 %v2420_v43, %v2728_v14  ;;  %1550 = vpow2.f32 %v795_v54  ;;  %v2737_v49 = vsub.f32 %v3464_v37, %v2726_v45 }
 0x17b   :  { %v2739_v18 = vpop.eup %1538  ;;  %1552 = vpow2.f32 %v1037_v26 }
 0x17c   :  { %3465 = vst [vmem:[#allocation33_spill] sm:$0xff] %v2737_v49  ;;  %v797_v9 = vmul.f32 1.442695, %v767_v36  ;;  %3466 = vst [vmem:[#allocation91_spill] sm:$0xff] %v2739_v18  ;;  %885 = vadd.xlane.f32.xlu0 %v2739_v18  ;;  %v1541_v61 = vpop.eup %1540  ;;  %v1039_v54 = vmul.f32 1.442695, %v2737_v49 }
 0x17d   :  { %v2741_v29 = vpop.xlane.xlu1 %245  ;;  %v2743_v35 = vpop.xlane.xlu0 %751  ;;  %1125 = vadd.xlane.f32.xlu1 %v1537_v24 }
 0x17e   :  { %3467 = vst [vmem:[#allocation92_spill] sm:$0xff] %v2743_v35  ;;  %v768_v43 = vsub.f32 %v2433_v17, %v2743_v35  ;;  %1554 = vpow2.f32 %v797_v9 }
 0x17f   :  { %v2749_v52 = vpop.eup %1542 }
 0x180   :  { %v799_v37 = vmul.f32 1.442695, %v768_v43  ;;  %3468 = vst [vmem:[#allocation93_spill] sm:$0xff] %v2749_v52  ;;  %887 = vadd.xlane.f32.xlu0 %v2749_v52  ;;  %v1545_v24 = vpop.eup %1544 }
 0x181   :  { %v2751_v36 = vpop.xlane.xlu1 %249  ;;  %v2753_v19 = vpop.xlane.xlu0 %247  ;;  %1127 = vadd.xlane.f32.xlu1 %v1541_v61 }
 0x182   :  { %1556 = vpow2.f32 %v799_v37 }
 0x183   :  { %1558 = vpow2.f32 %v1039_v54  ;;  %v2756_v18 = vpop.eup %1546 }
 0x184   :  { %3469 = vst [vmem:[#allocation94_spill] sm:$0xff] %v2756_v18  ;;  %889 = vadd.xlane.f32.xlu0 %v2756_v18  ;;  %v1549_v9 = vpop.eup %1548 }
 0x185   :  { %v2758_v17 = vpop.xlane.xlu1 %253  ;;  %v2760_v26 = vpop.xlane.xlu0 %251  ;;  %1129 = vadd.xlane.f32.xlu1 %v1545_v24 }
 0x187   :  { %v2763_v43 = vpop.eup %1550 }
 0x188   :  { %3470 = vst [vmem:[#allocation95_spill] sm:$0xff] %v2763_v43  ;;  %891 = vadd.xlane.f32.xlu0 %v2763_v43  ;;  %v1553_v54 = vpop.eup %1552 }
 0x189   :  { %v2765_v49 = vpop.xlane.xlu1 %257  ;;  %v2767_v37 = vpop.xlane.xlu0 %255  ;;  %1131 = vadd.xlane.f32.xlu1 %v1549_v9 }
 0x18a   :  { %3471 = vst [vmem:[#allocation96_spill] sm:$0xff] %v2765_v49  ;;  %3472 = vst [vmem:[#allocation97_spill] sm:$0xff] %v2767_v37  ;;  %v289_v61 = vsub.f32 %v1948_v23, %v2765_v49 }
 0x18b   :  { %v2772_v35 = vpop.eup %1554 }
 0x18c   :  { %v305_v52 = vmul.f32 1.442695, %v289_v61  ;;  %893 = vadd.xlane.f32.xlu0 %v2772_v35 }
 0x18d   :  { %v2774_v24 = vpop.xlane.xlu1 %261  ;;  %v2776_v18 = vpop.xlane.xlu0 %259  ;;  %1133 = vadd.xlane.f32.xlu1 %v1553_v54 }
 0x18e   :  { %3473 = vst [vmem:[#allocation98_spill] sm:$0xff] %v2774_v24  ;;  %3474 = vst [vmem:[#allocation99_spill] sm:$0xff] %v2776_v18  ;;  %1560 = vpow2.f32 %v305_v52  ;;  %v291_v9 = vsub.f32 %v1963_v27, %v2774_v24  ;;  %v290_v43 = vsub.f32 %v1968_v31, %v2776_v18 }
 0x18f   :  { %v2783_v37 = vpop.eup %1556 }
 0x190   :  { %v309_v23 = vmul.f32 1.442695, %v291_v9  ;;  %v307_v61 = vmul.f32 1.442695, %v290_v43  ;;  %v1559_v49 = vpop.eup %1558  ;;  %895 = vadd.xlane.f32.xlu0 %v2783_v37 }
 0x191   :  { %v2785_v14 = vpop.xlane.xlu1 %435  ;;  %v2787_v45 = vpop.xlane.xlu0 %433  ;;  %1135 = vadd.xlane.f32.xlu1 %v1559_v49 }
 0x192   :  { %3475 = vst [vmem:[#allocation100_spill] sm:$0xff] %v2787_v45  ;;  %1562 = vpow2.f32 %v309_v23  ;;  %v466_v52 = vsub.f32 %v2137_v41, %v2785_v14  ;;  %v465_v27 = vsub.f32 %v2126_v34, %v2787_v45 }
 0x193   :  { %1564 = vpow2.f32 %v307_v61 }
 0x194   :  { %v483_v31 = vmul.f32 1.442695, %v466_v52  ;;  %v481_v54 = vmul.f32 1.442695, %v465_v27 }
 0x195   :  { %v2794_v9 = vpop.xlane.xlu1 %437  ;;  %v2796_v43 = vpop.xlane.xlu0 %263 }
 0x196   :  { %3476 = vst [vmem:[#allocation101_spill] sm:$0xff] %v2794_v9  ;;  %3477 = vst [vmem:[#allocation102_spill] sm:$0xff] %v2796_v43  ;;  %1566 = vpow2.f32 %v483_v31  ;;  %v467_v23 = vsub.f32 %v2139_v42, %v2794_v9  ;;  %v292_v49 = vsub.f32 %v1986_v38, %v2796_v43 }
 0x197   :  { %1568 = vpow2.f32 %v481_v54 }
 0x198   :  { %v485_v24 = vmul.f32 1.442695, %v467_v23  ;;  %v311_v41 = vmul.f32 1.442695, %v292_v49 }
 0x199   :  { %v2802_v18 = vpop.xlane.xlu1 %439  ;;  %v2804_v34 = vpop.xlane.xlu0 %265 }
 0x19a   :  { %3478 = vst [vmem:[#allocation103_spill] sm:$0xff] %v2802_v18  ;;  %3479 = vst [vmem:[#allocation104_spill] sm:$0xff] %v2804_v34  ;;  %1570 = vpow2.f32 %v485_v24  ;;  %v468_v61 = vsub.f32 %v2150_v50, %v2802_v18  ;;  %v293_v52 = vsub.f32 %v1988_v39, %v2804_v34  ;;  %v3523_v18 = vld [vmem:[#allocation48_spill] sm:$0xff] }
 0x19b   :  { %v1561_v27 = vpop.eup %1560  ;;  %1572 = vpow2.f32 %v311_v41 }
 0x19c   :  { %v487_v42 = vmul.f32 1.442695, %v468_v61  ;;  %v313_v31 = vmul.f32 1.442695, %v293_v52  ;;  %337 = vadd.xlane.f32.xlu1 %v1561_v27 }
 0x19d   :  { %v2810_v38 = vpop.xlane.xlu1 %441  ;;  %v2812_v54 = vpop.xlane.xlu0 %267 }
 0x19e   :  { %3480 = vst [vmem:[#allocation105_spill] sm:$0xff] %v2810_v38  ;;  %3481 = vst [vmem:[#allocation106_spill] sm:$0xff] %v2812_v54  ;;  %1574 = vpow2.f32 %v487_v42  ;;  %v469_v23 = vsub.f32 %v2152_v51, %v2810_v38  ;;  %v294_v24 = vsub.f32 %v2009_v47, %v2812_v54  ;;  %v3491_v54 = vld [vmem:[#allocation35_spill] sm:$0xff] }
 0x19f   :  { %v1563_v50 = vpop.eup %1562  ;;  %1576 = vpow2.f32 %v313_v31 }
 0x1a0   :  { %v1565_v49 = vpop.eup %1564  ;;  %v489_v39 = vmul.f32 1.442695, %v469_v23  ;;  %v315_v34 = vmul.f32 1.442695, %v294_v24  ;;  %341 = vadd.xlane.f32.xlu1 %v1563_v50 }
 0x1a1   :  { %339 = vadd.xlane.f32.xlu0 %v1565_v49  ;;  %v2818_v41 = vpop.xlane.xlu1 %443  ;;  %v2820_v61 = vpop.xlane.xlu0 %269 }
 0x1a2   :  { %3482 = vst [vmem:[#allocation107_spill] sm:$0xff] %v2818_v41  ;;  %3483 = vst [vmem:[#allocation108_spill] sm:$0xff] %v2820_v61  ;;  %1578 = vpow2.f32 %v489_v39  ;;  %v470_v52 = vsub.f32 %v2163_v59, %v2818_v41  ;;  %v295_v51 = vsub.f32 %v2011_v48, %v2820_v61 }
 0x1a3   :  { %v1567_v27 = vpop.eup %1566  ;;  %1580 = vpow2.f32 %v315_v34 }
 0x1a4   :  { %v491_v47 = vmul.f32 1.442695, %v470_v52  ;;  %v317_v42 = vmul.f32 1.442695, %v295_v51  ;;  %515 = vadd.xlane.f32.xlu1 %v1567_v27  ;;  %v1569_v31 = vpop.eup %1568 }
 0x1a5   :  { %v2826_v23 = vpop.xlane.xlu1 %445  ;;  %v2828_v24 = vpop.xlane.xlu0 %271  ;;  %513 = vadd.xlane.f32.xlu0 %v1569_v31 }
 0x1a6   :  { %3484 = vst [vmem:[#allocation109_spill] sm:$0xff] %v2826_v23  ;;  %3485 = vst [vmem:[#allocation110_spill] sm:$0xff] %v2828_v24  ;;  %1582 = vpow2.f32 %v491_v47  ;;  %v471_v50 = vsub.f32 %v2165_v60, %v2826_v23  ;;  %v296_v59 = vsub.f32 %v2032_v56, %v2828_v24 }
 0x1a7   :  { %v1571_v49 = vpop.eup %1570  ;;  %1584 = vpow2.f32 %v317_v42 }
 0x1a8   :  { %v493_v48 = vmul.f32 1.442695, %v471_v50  ;;  %v319_v34 = vmul.f32 1.442695, %v296_v59  ;;  %517 = vadd.xlane.f32.xlu1 %v1571_v49  ;;  %v1573_v39 = vpop.eup %1572 }
 0x1a9   :  { %v2834_v52 = vpop.xlane.xlu1 %447  ;;  %v2836_v51 = vpop.xlane.xlu0 %273  ;;  %343 = vadd.xlane.f32.xlu0 %v1573_v39 }
 0x1aa   :  { %3486 = vst [vmem:[#allocation111_spill] sm:$0xff] %v2834_v52  ;;  %1586 = vpow2.f32 %v493_v48  ;;  %v472_v27 = vsub.f32 %v2176_v4, %v2834_v52  ;;  %v297_v60 = vsub.f32 %v2034_v57, %v2836_v51 }
 0x1ab   :  { %v1575_v47 = vpop.eup %1574  ;;  %1588 = vpow2.f32 %v319_v34 }
 0x1ac   :  { %v495_v56 = vmul.f32 1.442695, %v472_v27  ;;  %v321_v42 = vmul.f32 1.442695, %v297_v60  ;;  %519 = vadd.xlane.f32.xlu1 %v1575_v47  ;;  %v1577_v31 = vpop.eup %1576 }
 0x1ad   :  { %v2842_v50 = vpop.xlane.xlu1 %275  ;;  %v2844_v59 = vpop.xlane.xlu0 %449  ;;  %345 = vadd.xlane.f32.xlu0 %v1577_v31 }
 0x1ae   :  { %1590 = vpow2.f32 %v495_v56  ;;  %v298_v49 = vsub.f32 %v2055_v1, %v2842_v50  ;;  %v473_v4 = vsub.f32 %v2178_v5, %v2844_v59 }
 0x1af   :  { %v1579_v48 = vpop.eup %1578  ;;  %1592 = vpow2.f32 %v321_v42 }
 0x1b0   :  { %v323_v57 = vmul.f32 1.442695, %v298_v49  ;;  %v497_v34 = vmul.f32 1.442695, %v473_v4  ;;  %521 = vadd.xlane.f32.xlu1 %v1579_v48  ;;  %v1581_v39 = vpop.eup %1580 }
 0x1b1   :  { %v2850_v27 = vpop.xlane.xlu1 %277  ;;  %v2852_v60 = vpop.xlane.xlu0 %451  ;;  %347 = vadd.xlane.f32.xlu0 %v1581_v39 }
 0x1b2   :  { %1594 = vpow2.f32 %v323_v57  ;;  %v299_v47 = vsub.f32 %v2057_v2, %v2850_v27  ;;  %v474_v1 = vsub.f32 %v2187_v13, %v2852_v60 }
 0x1b3   :  { %v1583_v56 = vpop.eup %1582  ;;  %1596 = vpow2.f32 %v497_v34 }
 0x1b4   :  { %v325_v5 = vmul.f32 1.442695, %v299_v47  ;;  %v499_v42 = vmul.f32 1.442695, %v474_v1  ;;  %523 = vadd.xlane.f32.xlu1 %v1583_v56  ;;  %v1585_v31 = vpop.eup %1584 }
 0x1b5   :  { %v2858_v49 = vpop.xlane.xlu1 %279  ;;  %v2860_v4 = vpop.xlane.xlu0 %453  ;;  %349 = vadd.xlane.f32.xlu0 %v1585_v31 }
 0x1b6   :  { %1598 = vpow2.f32 %v325_v5  ;;  %v300_v48 = vsub.f32 %v2078_v10, %v2858_v49  ;;  %v475_v2 = vsub.f32 %v2327_v44, %v2860_v4 }
 0x1b7   :  { %v1587_v57 = vpop.eup %1586  ;;  %1600 = vpow2.f32 %v499_v42 }
 0x1b8   :  { %v327_v13 = vmul.f32 1.442695, %v300_v48  ;;  %v501_v34 = vmul.f32 1.442695, %v475_v2  ;;  %525 = vadd.xlane.f32.xlu1 %v1587_v57  ;;  %v1589_v39 = vpop.eup %1588 }
 0x1b9   :  { %v2866_v47 = vpop.xlane.xlu1 %281  ;;  %v2868_v1 = vpop.xlane.xlu0 %455  ;;  %351 = vadd.xlane.f32.xlu0 %v1589_v39 }
 0x1ba   :  { %1602 = vpow2.f32 %v327_v13  ;;  %v301_v56 = vsub.f32 %v2080_v11, %v2866_v47  ;;  %v476_v10 = vsub.f32 %v2331_v40, %v2868_v1 }
 0x1bb   :  { %v1591_v5 = vpop.eup %1590  ;;  %1604 = vpow2.f32 %v501_v34 }
 0x1bc   :  { %v329_v44 = vmul.f32 1.442695, %v301_v56  ;;  %v503_v42 = vmul.f32 1.442695, %v476_v10  ;;  %527 = vadd.xlane.f32.xlu1 %v1591_v5  ;;  %v1593_v31 = vpop.eup %1592  ;;  %v1398_v5 = vadd.f32 -1000.0, %v2459_v55  ;;  %v3492_v55 = vld [vmem:[#allocation36_spill] sm:$0xff] }
 0x1bd   :  { %v2874_v48 = vpop.xlane.xlu1 %283  ;;  %v2876_v2 = vpop.xlane.xlu0 %457  ;;  %353 = vadd.xlane.f32.xlu0 %v1593_v31 }
 0x1be   :  { %1606 = vpow2.f32 %v329_v44  ;;  %v302_v57 = vsub.f32 %v2101_v20, %v2874_v48  ;;  %v477_v11 = vsub.f32 %v2362_v32, %v2876_v2  ;;  %v1057_v31 = vsub.f32 %v1398_v5, %v2535_v16 }
 0x1bf   :  { %v1595_v13 = vpop.eup %1594  ;;  %1608 = vpow2.f32 %v503_v42  ;;  %v1399_v16 = vadd.f32 -1000.0, %v3491_v54  ;;  %v3495_v54 = vld [vmem:[#allocation38_spill] sm:$0xff] }
 0x1c0   :  { %v1597_v40 = vpop.eup %1596  ;;  %v331_v34 = vmul.f32 1.442695, %v302_v57  ;;  %v505_v39 = vmul.f32 1.442695, %v477_v11 }
 0x1c1   :  { %529 = vadd.xlane.f32.xlu1 %v1597_v40  ;;  %v2882_v56 = vpop.xlane.xlu1 %285  ;;  %v2884_v10 = vpop.xlane.xlu0 %459  ;;  %355 = vadd.xlane.f32.xlu0 %v1595_v13  ;;  %v1382_v13 = vadd.f32 -1000.0, %v2505_v7 }
 0x1c2   :  { %3487 = vst [vmem:[#allocation112_spill] sm:$0xff] %v2882_v56  ;;  %1610 = vpow2.f32 %v331_v34  ;;  %v303_v20 = vsub.f32 %v2103_v21, %v2882_v56  ;;  %v478_v32 = vsub.f32 %v2366_v25, %v2884_v10  ;;  %v3489_v21 = vld [vmem:[#allocation21_spill] sm:$0xff]  ;;  %v3490_v25 = vld [vmem:[#allocation30_spill] sm:$0xff] }
 0x1c3   :  { %v1599_v44 = vpop.eup %1598  ;;  %1612 = vpow2.f32 %v505_v39 }
 0x1c4   :  { %v1601_v42 = vpop.eup %1600  ;;  %v333_v57 = vmul.f32 1.442695, %v303_v20  ;;  %v507_v11 = vmul.f32 1.442695, %v478_v32  ;;  %v1073_v20 = vmul.f32 1.442695, %v1057_v31  ;;  %v817_v32 = vsub.f32 %v1382_v13, %v2544_v0 }
 0x1c5   :  { %531 = vadd.xlane.f32.xlu1 %v1601_v42  ;;  %v2892_v40 = vpop.xlane.xlu1 %287  ;;  %v2894_v24 = vpop.xlane.xlu0 %461  ;;  %357 = vadd.xlane.f32.xlu0 %v1599_v44  ;;  %v3493_v44 = vld [vmem:[#allocation61_spill] sm:$0xff]  ;;  %v1401_v0 = vadd.f32 -1000.0, %v3495_v54  ;;  %v3496_v13 = vld [vmem:[#allocation51_spill] sm:$0xff] }
 0x1c6   :  { %3488 = vst [vmem:[#allocation113_spill] sm:$0xff] %v2892_v40  ;;  %1614 = vpow2.f32 %v333_v57  ;;  %v304_v34 = vsub.f32 %v3489_v21, %v2892_v40  ;;  %v479_v39 = vsub.f32 %v3490_v25, %v2894_v24  ;;  %v1400_v57 = vadd.f32 -1000.0, %v3492_v55  ;;  %v3494_v40 = vld [vmem:[#allocation52_spill] sm:$0xff]  ;;  %v3498_v55 = vld [vmem:[#allocation54_spill] sm:$0xff]  ;;  %v3500_v54 = vld [vmem:[#allocation65_spill] sm:$0xff] }
 0x1c7   :  { %v1603_v61 = vpop.eup %1602  ;;  %1616 = vpow2.f32 %v507_v11  ;;  %v1058_v52 = vsub.f32 %v1399_v16, %v3493_v44  ;;  %v1383_v23 = vadd.f32 -1000.0, %v3494_v40  ;;  %v833_v11 = vmul.f32 1.442695, %v817_v32 }
 0x1c8   :  { %v1605_v5 = vpop.eup %1604  ;;  %v335_v42 = vmul.f32 1.442695, %v304_v34  ;;  %v509_v43 = vmul.f32 1.442695, %v479_v39  ;;  %v1059_v31 = vsub.f32 %v1400_v57, %v2555_v33  ;;  %v1384_v34 = vadd.f32 -1000.0, %v3496_v13  ;;  %v3499_v57 = vld [vmem:[#allocation40_spill] sm:$0xff] }
 0x1c9   :  { %533 = vadd.xlane.f32.xlu1 %v1605_v5  ;;  %359 = vadd.xlane.f32.xlu0 %v1603_v61  ;;  %v1075_v39 = vmul.f32 1.442695, %v1058_v52  ;;  %v818_v5 = vsub.f32 %v1383_v23, %v2557_v15  ;;  %v3497_v61 = vld [vmem:[#allocation37_spill] sm:$0xff] }
 0x1ca   :  { %1618 = vpow2.f32 %v335_v42  ;;  %v1402_v42 = vadd.f32 -1000.0, %v3497_v61  ;;  %v1077_v32 = vmul.f32 1.442695, %v1059_v31  ;;  %v819_v33 = vsub.f32 %v1384_v34, %v2568_v30  ;;  %v3501_v52 = vld [vmem:[#allocation53_spill] sm:$0xff]  ;;  %v3503_v34 = vld [vmem:[#allocation67_spill] sm:$0xff] }
 0x1cb   :  { %v1607_v21 = vpop.eup %1606  ;;  %1620 = vpow2.f32 %v509_v43  ;;  %v1060_v43 = vsub.f32 %v1401_v0, %v2566_v3  ;;  %v1386_v15 = vadd.f32 -1000.0, %v3501_v52  ;;  %v835_v23 = vmul.f32 1.442695, %v818_v5  ;;  %v3502_v0 = vld [vmem:[#allocation39_spill] sm:$0xff]  ;;  %v3505_v5 = vld [vmem:[#allocation42_spill] sm:$0xff] }
 0x1cc   :  { %v1609_v25 = vpop.eup %1608  ;;  %1622 = vpow2.f32 %v1073_v20  ;;  %v1385_v20 = vadd.f32 -1000.0, %v3498_v55  ;;  %v1061_v41 = vsub.f32 %v1402_v42, %v3500_v54  ;;  %v1404_v61 = vadd.f32 -1000.0, %v3502_v0  ;;  %v3504_v54 = vld [vmem:[#allocation56_spill] sm:$0xff] }
 0x1cd   :  { %535 = vadd.xlane.f32.xlu1 %v1609_v25  ;;  %361 = vadd.xlane.f32.xlu0 %v1607_v21  ;;  %1624 = vpow2.f32 %v833_v11  ;;  %v1403_v25 = vadd.f32 -1000.0, %v3499_v57  ;;  %v1079_v56 = vmul.f32 1.442695, %v1060_v43  ;;  %v837_v30 = vmul.f32 1.442695, %v819_v33  ;;  %v3506_v43 = vld [vmem:[#allocation55_spill] sm:$0xff] }
 0x1ce   :  { %1626 = vpow2.f32 %v1075_v39  ;;  %v820_v21 = vsub.f32 %v1385_v20, %v2579_v58  ;;  %v821_v57 = vsub.f32 %v1386_v15, %v3503_v34  ;;  %v1081_v42 = vmul.f32 1.442695, %v1061_v41  ;;  %v3509_v34 = vld [vmem:[#allocation44_spill] sm:$0xff] }
 0x1cf   :  { %v1611_v16 = vpop.eup %1610  ;;  %v1062_v11 = vsub.f32 %v1403_v25, %v2588_v22  ;;  %1628 = vpow2.f32 %v1077_v32  ;;  %v1063_v39 = vsub.f32 %v1404_v61, %v2602_v28  ;;  %v1405_v58 = vadd.f32 -1000.0, %v3505_v5  ;;  %v3507_v28 = vld [vmem:[#allocation41_spill] sm:$0xff] }
 0x1d0   :  { %v1613_v44 = vpop.eup %1612  ;;  %1630 = vpow2.f32 %v835_v23  ;;  %v1388_v0 = vadd.f32 -1000.0, %v3506_v43  ;;  %v841_v25 = vmul.f32 1.442695, %v821_v57  ;;  %v1406_v61 = vadd.f32 -1000.0, %v3507_v28  ;;  %v3508_v23 = vld [vmem:[#allocation72_spill] sm:$0xff] }
 0x1d1   :  { %363 = vadd.xlane.f32.xlu1 %v1611_v16  ;;  %537 = vadd.xlane.f32.xlu0 %v1613_v44  ;;  %v1387_v16 = vadd.f32 -1000.0, %v3504_v54  ;;  %v839_v44 = vmul.f32 1.442695, %v820_v21  ;;  %1632 = vpow2.f32 %v1079_v56  ;;  %v1083_v22 = vmul.f32 1.442695, %v1062_v11 }
 0x1d2   :  { %1634 = vpow2.f32 %v837_v30  ;;  %v1064_v41 = vsub.f32 %v1405_v58, %v2615_v12  ;;  %v823_v21 = vsub.f32 %v1388_v0, %v3508_v23  ;;  %v1407_v5 = vadd.f32 -1000.0, %v3509_v34  ;;  %v3511_v30 = vld [vmem:[#allocation75_spill] sm:$0xff]  ;;  %v3512_v0 = vld [vmem:[#allocation76_spill] sm:$0xff] }
 0x1d3   :  { %v1615_v3 = vpop.eup %1614  ;;  %v822_v32 = vsub.f32 %v1387_v16, %v2604_v53  ;;  %1636 = vpow2.f32 %v1081_v42  ;;  %v3510_v53 = vld [vmem:[#allocation58_spill] sm:$0xff]  ;;  %v1065_v12 = vsub.f32 %v1406_v61, %v3511_v30  ;;  %v3513_v23 = vld [vmem:[#allocation79_spill] sm:$0xff]  ;;  %v3516_v30 = vld [vmem:[#allocation80_spill] sm:$0xff] }
 0x1d4   :  { %v1617_v31 = vpop.eup %1616  ;;  %1638 = vpow2.f32 %v839_v44  ;;  %v1389_v11 = vadd.f32 -1000.0, %v3510_v53  ;;  %v1087_v16 = vmul.f32 1.442695, %v1064_v41  ;;  %v1066_v43 = vsub.f32 %v1407_v5, %v3513_v23  ;;  %v3515_v61 = vld [vmem:[#allocation43_spill] sm:$0xff] }
 0x1d5   :  { %539 = vadd.xlane.f32.xlu1 %v1617_v31  ;;  %365 = vadd.xlane.f32.xlu0 %v1615_v3  ;;  %v1085_v31 = vmul.f32 1.442695, %v1063_v39  ;;  %1640 = vpow2.f32 %v1083_v22  ;;  %v843_v57 = vmul.f32 1.442695, %v822_v32  ;;  %v845_v39 = vmul.f32 1.442695, %v823_v21 }
 0x1d6   :  { %1642 = vpow2.f32 %v841_v25  ;;  %v1089_v22 = vmul.f32 1.442695, %v1065_v12  ;;  %v1408_v25 = vadd.f32 -1000.0, %v3515_v61  ;;  %v3518_v12 = vld [vmem:[#allocation59_spill] sm:$0xff] }
 0x1d7   :  { %v1619_v20 = vpop.eup %1618  ;;  %1644 = vpow2.f32 %v1085_v31  ;;  %v1391_v53 = vadd.f32 -1000.0, %v3518_v12 }
 0x1d8   :  { %v1621_v33 = vpop.eup %1620 }
 0x1d9   :  { %v1623_v15 = vpop.eup %1622  ;;  %367 = vadd.xlane.f32.xlu1 %v1619_v20  ;;  %v1106_v3 = vpop.xlane.xlu0 %1105  ;;  %541 = vadd.xlane.f32.xlu0 %v1621_v33  ;;  %v824_v20 = vsub.f32 %v1389_v11, %v3512_v0  ;;  %v1091_v11 = vmul.f32 1.442695, %v1066_v43 }
 0x1da   :  { %v1137_v56 = vsub.f32 %v1106_v3, %v1623_v15  ;;  %v1625_v42 = vpop.eup %1624  ;;  %v3514_v15 = vld [vmem:[#allocation57_spill] sm:$0xff] }
 0x1db   :  { %v1627_v33 = vpop.eup %1626  ;;  %v1390_v3 = vadd.f32 -1000.0, %v3514_v15  ;;  %v847_v21 = vmul.f32 1.442695, %v824_v20  ;;  %v3519_v20 = vld [vmem:[#allocation82_spill] sm:$0xff] }
 0x1dc   :  { %v1153_v58 = vmax.f32 %v1137_v56, 1e-30  ;;  %v1629_v31 = vpop.eup %1628 }
 0x1dd   :  { %v866_v54 = vpop.xlane.xlu0 %865  ;;  %v825_v5 = vsub.f32 %v1390_v3, %v3516_v30  ;;  %v826_v3 = vsub.f32 %v1391_v53, %v3519_v20 }
 0x1de   :  { %1646 = vlog2.f32 %v1153_v58  ;;  %v897_v44 = vsub.f32 %v866_v54, %v1625_v42  ;;  %v1108_v32 = vpop.xlane.xlu1 %1107  ;;  %v3517_v58 = vld [vmem:[#allocation81_spill] sm:$0xff] }
 0x1df   :  { %1648 = vpow2.f32 %v843_v57  ;;  %v1138_v41 = vsub.f32 %v1108_v32, %v1627_v33  ;;  %v1067_v54 = vsub.f32 %v1408_v25, %v3517_v58  ;;  %v1631_v57 = vpop.eup %1630  ;;  %v849_v43 = vmul.f32 1.442695, %v825_v5  ;;  %v3521_v5 = vld [vmem:[#allocation83_spill] sm:$0xff] }
 0x1e0   :  { %1650 = vpow2.f32 %v1087_v16  ;;  %v913_v56 = vmax.f32 %v897_v44, 1e-30  ;;  %v1633_v16 = vpop.eup %1632 }
 0x1e1   :  { %1652 = vpow2.f32 %v845_v39  ;;  %v1110_v0 = vpop.xlane.xlu0 %1109  ;;  %v1154_v42 = vmax.f32 %v1138_v41, 1e-30  ;;  %v1635_v39 = vpop.eup %1634  ;;  %v1093_v25 = vmul.f32 1.442695, %v1067_v54 }
 0x1e2   :  { %1654 = vrcp.f32 %v913_v56  ;;  %v1139_v23 = vsub.f32 %v1110_v0, %v1629_v31  ;;  %v868_v52 = vpop.xlane.xlu1 %867  ;;  %v1637_v30 = vpop.eup %1636  ;;  %v3520_v0 = vld [vmem:[#allocation46_spill] sm:$0xff] }
 0x1e3   :  { %1656 = vpow2.f32 %v1089_v22  ;;  %v898_v44 = vsub.f32 %v868_v52, %v1631_v57  ;;  %v1639_v31 = vpop.eup %1638  ;;  %v1409_v58 = vadd.f32 -1000.0, %v3520_v0 }
 0x1e4   :  { %1658 = vlog2.f32 %v1154_v42  ;;  %v1155_v33 = vmax.f32 %v1139_v23, 1e-30  ;;  %v1641_v38 = vpop.eup %1640 }
 0x1e5   :  { %1660 = vpow2.f32 %v847_v21  ;;  %v1112_v32 = vpop.xlane.xlu0 %1111  ;;  %v914_v41 = vmax.f32 %v898_v44, 1e-30  ;;  %v1643_v23 = vpop.eup %1642  ;;  %v851_v21 = vmul.f32 1.442695, %v826_v3  ;;  %v1068_v53 = vsub.f32 %v1409_v58, %v3521_v5  ;;  %v3522_v44 = vld [vmem:[#allocation45_spill] sm:$0xff] }
 0x1e6   :  { %1662 = vpow2.f32 %v1091_v11  ;;  %v1140_v56 = vsub.f32 %v1112_v32, %v1633_v16  ;;  %v870_v22 = vpop.xlane.xlu1 %869  ;;  %v1645_v20 = vpop.eup %1644  ;;  %v1410_v32 = vadd.f32 -1000.0, %v3522_v44 }
 0x1e7   :  { %1664 = vlog2.f32 %v1155_v33  ;;  %v899_v52 = vsub.f32 %v870_v22, %v1635_v39  ;;  %v1095_v3 = vmul.f32 1.442695, %v1068_v53 }
 0x1e8   :  { %1666 = vrcp.f32 %v914_v41  ;;  %v1156_v42 = vmax.f32 %v1140_v56, 1e-30  ;;  %v1411_v41 = vadd.f32 -1000.0, %v3523_v18  ;;  %v1069_v58 = vsub.f32 %v1410_v32, %v2684_v63 }
 0x1e9   :  { %1668 = vpow2.f32 %v849_v43  ;;  %v1114_v57 = vpop.xlane.xlu0 %1113  ;;  %v915_v11 = vmax.f32 %v899_v52, 1e-30 }
 0x1ea   :  { %1670 = vpow2.f32 %v1093_v25  ;;  %v1141_v54 = vsub.f32 %v1114_v57, %v1637_v30  ;;  %v872_v33 = vpop.xlane.xlu1 %871  ;;  %v1070_v52 = vsub.f32 %v1411_v41, %v2698_v8  ;;  %v1097_v32 = vmul.f32 1.442695, %v1069_v58  ;;  %v3525_v41 = vld [vmem:[#allocation60_spill] sm:$0xff] }
 0x1eb   :  { %v1647_v16 = vpop.eup %1646  ;;  %1672 = vlog2.f32 %v1156_v42  ;;  %v900_v39 = vsub.f32 %v872_v33, %v1639_v31  ;;  %v1392_v42 = vadd.f32 -1000.0, %v2741_v29  ;;  %v1393_v33 = vadd.f32 -1000.0, %v2753_v19 }
 0x1ec   :  { %v1649_v55 = vpop.eup %1648  ;;  %1674 = vrcp.f32 %v915_v11  ;;  %v1157_v56 = vmax.f32 %v1141_v54, 1e-30  ;;  %v1170_v25 = vmul.f32 0.6931472, %v1647_v16  ;;  %v3524_v54 = vld [vmem:[#allocation69_spill] sm:$0xff] }
 0x1ed   :  { %v2944_v43 = vpop.eup %1650  ;;  %1676 = vpow2.f32 %v851_v21  ;;  %v1116_v22 = vpop.xlane.xlu0 %1115  ;;  %v916_v5 = vmax.f32 %v900_v39, 1e-30 }
 0x1ee   :  { %v2947_v30 = vpop.eup %1652  ;;  %v1142_v57 = vsub.f32 %v1116_v22, %v1641_v38  ;;  %1678 = vlog2.f32 %v1157_v56  ;;  %v874_v31 = vpop.xlane.xlu1 %873  ;;  %v1201_v9 = vsub.f32 %v3525_v41, %v1170_v25  ;;  %v1099_v38 = vmul.f32 1.442695, %v1070_v52  ;;  %v3526_v56 = vld [vmem:[#allocation84_spill] sm:$0xff] }
 0x1ef   :  { %v1655_v13 = vpop.eup %1654  ;;  %1680 = vrcp.f32 %v916_v5  ;;  %v901_v21 = vsub.f32 %v874_v31, %v1643_v23  ;;  %v827_v22 = vsub.f32 %v1392_v42, %v3526_v56  ;;  %v3527_v23 = vld [vmem:[#allocation47_spill] sm:$0xff] }
 0x1f0   :  { %v2951_v11 = vpop.eup %1656  ;;  %v1158_v53 = vmax.f32 %v1142_v57, 1e-30  ;;  %v945_v63 = vmul.f32 %v1655_v13, %v3524_v54  ;;  %1682 = vpow2.f32 %v1095_v3  ;;  %v1412_v57 = vadd.f32 -1000.0, %v3527_v23 }
 0x1f1   :  { %v1659_v16 = vpop.eup %1658  ;;  %v1118_v8 = vpop.xlane.xlu0 %1117  ;;  %v917_v7 = vmax.f32 %v901_v21, 1e-30  ;;  %v1394_v54 = vadd.f32 -1000.0, %v2751_v36 }
 0x1f2   :  { %v2956_v39 = vpop.eup %1660  ;;  %v1143_v45 = vsub.f32 %v1118_v8, %v1645_v20  ;;  %v1172_v13 = vmul.f32 0.6931472, %v1659_v16  ;;  %1684 = vlog2.f32 %v1158_v53  ;;  %v876_v3 = vpop.xlane.xlu1 %875  ;;  %v1217_v58 = vmul.f32 %v1201_v9, %v945_v63  ;;  %v3529_v63 = vld [vmem:[#allocation71_spill] sm:$0xff] }
 0x1f3   :  { %v2959_v5 = vpop.eup %1662  ;;  %1686 = vrcp.f32 %v917_v7  ;;  %v902_v25 = vsub.f32 %v876_v3, %v1649_v55  ;;  %v1071_v52 = vsub.f32 %v1412_v57, %v2712_v6  ;;  %v828_v20 = vsub.f32 %v1393_v33, %v2686_v46  ;;  %v3530_v46 = vld [vmem:[#allocation62_spill] sm:$0xff] }
 0x1f4   :  { %v1665_v31 = vpop.eup %1664  ;;  %v1159_v41 = vmax.f32 %v1143_v45, 1e-30  ;;  %1688 = vpow2.f32 %v1097_v32  ;;  %v1233_v21 = vsel %vm1956_vm1, 0.0, %v1217_v58  ;;  %v853_v9 = vmul.f32 1.442695, %v827_v22  ;;  %v3531_v57 = vld [vmem:[#allocation50_spill] sm:$0xff] }
 0x1f5   :  { %v1667_v40 = vpop.eup %1666  ;;  %v1120_v8 = vpop.xlane.xlu0 %1119  ;;  %1690 = vpow2.f32 %v1099_v38  ;;  %v918_v53 = vmax.f32 %v902_v25, 1e-30  ;;  %1249 = vadd.xlane.f32.xlu0 %v1233_v21  ;;  %v1174_v45 = vmul.f32 0.6931472, %v1665_v31  ;;  %v1202_v33 = vsub.f32 %v3530_v46, %v1172_v13 }
 0x1f6   :  { %v2967_v16 = vpop.eup %1668  ;;  %v946_v7 = vmul.f32 %v1667_v40, %v3529_v63  ;;  %1692 = vlog2.f32 %v1159_v41  ;;  %v878_v32 = vpop.xlane.xlu1 %877  ;;  %v1144_v6 = vsub.f32 %v1120_v8, %v2944_v43  ;;  %v2975_v3 = vadd.f32 -1000.0, %v3531_v57  ;;  %v3532_v8 = vld [vmem:[#allocation74_spill] sm:$0xff] }
 0x1f7   :  { %v2970_v55 = vpop.eup %1670  ;;  %v829_v38 = vsub.f32 %v1394_v54, %v2700_v62  ;;  %1694 = vrcp.f32 %v918_v53  ;;  %v903_v22 = vsub.f32 %v878_v32, %v2947_v30  ;;  %v1101_v40 = vmul.f32 1.442695, %v1071_v52  ;;  %v3534_v52 = vld [vmem:[#allocation63_spill] sm:$0xff] }
 0x1f8   :  { %v1673_v56 = vpop.eup %1672  ;;  %v855_v25 = vmul.f32 1.442695, %v828_v20  ;;  %v1395_v31 = vadd.f32 -1000.0, %v2760_v26  ;;  %v1218_v41 = vmul.f32 %v1202_v33, %v946_v7  ;;  %1696 = vpow2.f32 %v853_v9 }
 0x1f9   :  { %v1675_v58 = vpop.eup %1674  ;;  %v1122_v42 = vpop.xlane.xlu0 %1121  ;;  %v919_v43 = vmax.f32 %v903_v22, 1e-30  ;;  %v1176_v46 = vmul.f32 0.6931472, %v1673_v56  ;;  %v1160_v62 = vmax.f32 %v1144_v6, 1e-30  ;;  %v1203_v20 = vsub.f32 %v3534_v52, %v1174_v45 }
 0x1fa   :  { %v2980_v21 = vpop.eup %1676  ;;  %v1145_v13 = vsub.f32 %v1122_v42, %v2951_v11  ;;  %v947_v63 = vmul.f32 %v1675_v58, %v3532_v8  ;;  %v880_v54 = vpop.xlane.xlu1 %879  ;;  %v1234_v30 = vsel %vm1971_vm2, 0.0, %v1218_v41  ;;  %v857_v57 = vmul.f32 1.442695, %v829_v38  ;;  %v3535_v22 = vld [vmem:[#allocation87_spill] sm:$0xff]  ;;  %v3536_v38 = vld [vmem:[#allocation78_spill] sm:$0xff] }
 0x1fb   :  { %v1679_v32 = vpop.eup %1678  ;;  %1698 = vrcp.f32 %v919_v43  ;;  %v904_v7 = vsub.f32 %v880_v54, %v2956_v39  ;;  %1251 = vadd.xlane.f32.xlu1 %v1234_v30  ;;  %v1396_v11 = vadd.f32 -1000.0, %v2758_v17  ;;  %v830_v56 = vsub.f32 %v1395_v31, %v3535_v22  ;;  %v3538_v54 = vld [vmem:[#allocation64_spill] sm:$0xff]  ;;  %v3539_v31 = vld [vmem:[#allocation89_spill] sm:$0xff] }
 0x1fc   :  { %v1161_v9 = vmax.f32 %v1145_v13, 1e-30  ;;  %v1681_v33 = vpop.eup %1680  ;;  %1700 = vpow2.f32 %v855_v25  ;;  %v1219_v6 = vmul.f32 %v1203_v20, %v947_v63  ;;  %v1178_v8 = vmul.f32 0.6931472, %v1679_v32  ;;  %v3541_v32 = vld [vmem:[#allocation97_spill] sm:$0xff]  ;;  %v3544_v13 = vld [vmem:[#allocation66_spill] sm:$0xff] }
 0x1fd   :  { %v1124_v58 = vpop.xlane.xlu0 %1123  ;;  %v2990_v42 = vpop.eup %1682  ;;  %v920_v41 = vmax.f32 %v904_v7, 1e-30  ;;  %v948_v43 = vmul.f32 %v1681_v33, %v3536_v38  ;;  %v1204_v53 = vsub.f32 %v3538_v54, %v1176_v46  ;;  %v1072_v63 = vsub.f32 %v2975_v3, %v3539_v31  ;;  %v3540_v7 = vld [vmem:[#allocation90_spill] sm:$0xff] }
 0x1fe   :  { %1702 = vlog2.f32 %v1161_v9  ;;  %v1146_v45 = vsub.f32 %v1124_v58, %v2959_v5  ;;  %v882_v39 = vpop.xlane.xlu1 %881  ;;  %v1235_v25 = vsel %vm1951_vm0, 0.0, %v1219_v6  ;;  %v831_v9 = vsub.f32 %v1396_v11, %v3540_v7  ;;  %v3547_v7 = vld [vmem:[#allocation25_spill] sm:$0xff] }
 0x1ff   :  { %1704 = vlog2.f32 %v1160_v62  ;;  %v1685_v30 = vpop.eup %1684  ;;  %v905_v52 = vsub.f32 %v882_v39, %v2967_v16  ;;  %1253 = vadd.xlane.f32.xlu0 %v1235_v25  ;;  %v1397_v62 = vadd.f32 -1000.0, %v3541_v32  ;;  %v1220_v33 = vmul.f32 %v1204_v53, %v948_v43  ;;  %v3546_v53 = vld [vmem:[#allocation92_spill] sm:$0xff] }
 0x200   :  { %1706 = vpow2.f32 %v1101_v40  ;;  %v1162_v20 = vmax.f32 %v1146_v45, 1e-30  ;;  %v1687_v5 = vpop.eup %1686  ;;  %v859_v46 = vmul.f32 1.442695, %v830_v56  ;;  %v3542_v40 = vld [vmem:[#allocation22_spill] sm:$0xff]  ;;  %v3549_v32 = vld [vmem:[#allocation68_spill] sm:$0xff] }
 0x201   :  { %1708 = vrcp.f32 %v920_v41  ;;  %v3002_v22 = vpop.eup %1688  ;;  %v921_v6 = vmax.f32 %v905_v52, 1e-30  ;;  %v949_v58 = vmul.f32 %v1687_v5, %v3542_v40  ;;  %v1180_v3 = vmul.f32 0.6931472, %v1685_v30  ;;  %v884_v39 = vpop.xlane.xlu0 %883 }
 0x202   :  { %1710 = vpow2.f32 %v857_v57  ;;  %v3005_v38 = vpop.eup %1690  ;;  %v3007_v16 = vpop.xlane.xlu1 %463  ;;  %v1236_v11 = vsel %vm1982_vm3, 0.0, %v1220_v33  ;;  %v1205_v41 = vsub.f32 %v3544_v13, %v1178_v8  ;;  %v3545_v57 = vld [vmem:[#allocation31_spill] sm:$0xff]  ;;  %v861_v54 = vmul.f32 1.442695, %v831_v9 }
 0x203   :  { %1712 = vlog2.f32 %v1162_v20  ;;  %v1693_v43 = vpop.eup %1692  ;;  %v480_v56 = vsub.f32 %v3545_v57, %v3007_v16  ;;  %1255 = vadd.xlane.f32.xlu1 %v1236_v11  ;;  %v832_v31 = vsub.f32 %v1397_v62, %v3546_v53  ;;  %v906_v30 = vsub.f32 %v884_v39, %v2980_v21 }
 0x204   :  { %1714 = vrcp.f32 %v921_v6  ;;  %v1695_v25 = vpop.eup %1694  ;;  %v1221_v52 = vmul.f32 %v1205_v41, %v949_v58  ;;  %v1103_v20 = vmul.f32 1.442695, %v1072_v63  ;;  %v1182_v8 = vmul.f32 0.6931472, %v1693_v43 }
 0x205   :  { %1716 = vpow2.f32 %v859_v46  ;;  %v511_v5 = vmul.f32 1.442695, %v480_v56  ;;  %v950_v33 = vmul.f32 %v1695_v25, %v3547_v7  ;;  %v1697_v40 = vpop.eup %1696  ;;  %v922_v45 = vmax.f32 %v906_v30, 1e-30  ;;  %v886_v11 = vpop.xlane.xlu0 %885  ;;  %v3550_v56 = vld [vmem:[#allocation27_spill] sm:$0xff] }
 0x206   :  { %v1126_v6 = vpop.xlane.xlu1 %1125  ;;  %v1237_v57 = vsel %vm1991_vm4, 0.0, %v1221_v52  ;;  %v1206_v9 = vsub.f32 %v3549_v32, %v1180_v3  ;;  %v907_v21 = vsub.f32 %v886_v11, %v1697_v40  ;;  %v863_v46 = vmul.f32 1.442695, %v832_v31 }
 0x207   :  { %1718 = vpow2.f32 %v511_v5  ;;  %v1147_v62 = vsub.f32 %v1126_v6, %v2970_v55  ;;  %1257 = vadd.xlane.f32.xlu0 %v1237_v57  ;;  %v3552_v55 = vld [vmem:[#allocation70_spill] sm:$0xff]  ;;  %vm1334_vm0 = vcmask 0  }
 0x208   :  { %v1699_v63 = vpop.eup %1698  ;;  %1720 = vpow2.f32 %v861_v54  ;;  %v1222_v58 = vmul.f32 %v1206_v9, %v950_v33  ;;  %v923_v43 = vmax.f32 %v907_v21, 1e-30  ;;  %v1207_v5 = vsub.f32 %v3552_v55, %v1182_v8 }
 0x209   :  { %v1701_v39 = vpop.eup %1700  ;;  %1722 = vrcp.f32 %v922_v45  ;;  %v1163_v41 = vmax.f32 %v1147_v62, 1e-30  ;;  %v951_v25 = vmul.f32 %v1699_v63, %v3550_v56  ;;  %v888_v3 = vpop.xlane.xlu0 %887 }
 0x20a   :  { %1724 = vpow2.f32 %v1103_v20  ;;  %v1128_v30 = vpop.xlane.xlu1 %1127  ;;  %v1238_v32 = vsel %vm2005_vm5, 0.0, %v1222_v58  ;;  %v908_v31 = vsub.f32 %v888_v3, %v1701_v39 }
 0x20b   :  { %v1703_v53 = vpop.eup %1702  ;;  %1726 = vlog2.f32 %v1163_v41  ;;  %v1148_v54 = vsub.f32 %v1128_v30, %v2990_v42  ;;  %1259 = vadd.xlane.f32.xlu1 %v1238_v32  ;;  %v1223_v40 = vmul.f32 %v1207_v5, %v951_v25  ;;  %v3554_v41 = vld [vmem:[#allocation29_spill] sm:$0xff]  ;;  %v3555_v25 = vld [vmem:[#allocation86_spill] sm:$0xff] }
 0x20c   :  { %v1705_v7 = vpop.eup %1704  ;;  %1728 = vrcp.f32 %v923_v43  ;;  %v1186_v6 = vmul.f32 0.6931472, %v1703_v53  ;;  %v924_v13 = vmax.f32 %v908_v31, 1e-30  ;;  %v3556_v30 = vld [vmem:[#allocation77_spill] sm:$0xff] }
 0x20d   :  { %v1707_v33 = vpop.eup %1706  ;;  %1730 = vpow2.f32 %v863_v46  ;;  %v1164_v20 = vmax.f32 %v1148_v54, 1e-30  ;;  %v1184_v11 = vmul.f32 0.6931472, %v1705_v7  ;;  %v1239_v8 = vsel %vm2014_vm6, 0.0, %v1223_v40  ;;  %v890_v21 = vpop.xlane.xlu0 %889  ;;  %v3557_v7 = vld [vmem:[#allocation73_spill] sm:$0xff] }
 0x20e   :  { %v1709_v45 = vpop.eup %1708  ;;  %v1130_v9 = vpop.xlane.xlu1 %1129  ;;  %v1209_v52 = vsub.f32 %v3556_v30, %v1186_v6 }
 0x20f   :  { %v1711_v57 = vpop.eup %1710  ;;  %1732 = vlog2.f32 %v1164_v20  ;;  %v1149_v42 = vsub.f32 %v1130_v9, %v3002_v22  ;;  %1261 = vadd.xlane.f32.xlu1 %v1239_v8  ;;  %v952_v46 = vmul.f32 %v1709_v45, %v3554_v41  ;;  %v1208_v54 = vsub.f32 %v3557_v7, %v1184_v11  ;;  %v3559_v11 = vld [vmem:[#allocation23_spill] sm:$0xff]  ;;  %v3560_v41 = vld [vmem:[#allocation88_spill] sm:$0xff] }
 0x210   :  { %v1713_v63 = vpop.eup %1712  ;;  %v909_v58 = vsub.f32 %v890_v21, %v1711_v57  ;;  %1734 = vrcp.f32 %v924_v13 }
 0x211   :  { %v1715_v39 = vpop.eup %1714  ;;  %v1165_v43 = vmax.f32 %v1149_v42, 1e-30  ;;  %v1188_v3 = vmul.f32 0.6931472, %v1713_v63  ;;  %v892_v5 = vpop.xlane.xlu0 %891  ;;  %v1224_v45 = vmul.f32 %v1208_v54, %v952_v46 }
 0x212   :  { %v925_v56 = vmax.f32 %v909_v58, 1e-30  ;;  %v953_v53 = vmul.f32 %v1715_v39, %v3555_v25  ;;  %v1717_v32 = vpop.eup %1716  ;;  %v1132_v55 = vpop.xlane.xlu1 %1131 }
 0x213   :  { %1736 = vlog2.f32 %v1165_v43  ;;  %v1150_v22 = vsub.f32 %v1132_v55, %v3005_v38  ;;  %v910_v31 = vsub.f32 %v892_v5, %v1717_v32  ;;  %v1210_v42 = vsub.f32 %v3559_v11, %v1188_v3 }
 0x214   :  { %v1225_v40 = vmul.f32 %v1209_v52, %v953_v53  ;;  %v1719_v20 = vpop.eup %1718  ;;  %1738 = vrcp.f32 %v925_v56  ;;  %v1240_v25 = vsel %vm2028_vm7, 0.0, %v1224_v45  ;;  %v3564_v45 = vld [vmem:[#allocation24_spill] sm:$0xff] }
 0x215   :  { %v1721_v13 = vpop.eup %1720  ;;  %v1166_v57 = vmax.f32 %v1150_v22, 1e-30  ;;  %v926_v9 = vmax.f32 %v910_v31, 1e-30  ;;  %543 = vadd.xlane.f32.xlu0 %v1719_v20  ;;  %v894_v63 = vpop.xlane.xlu0 %893  ;;  %v3563_v20 = vld [vmem:[#allocation91_spill] sm:$0xff] }
 0x216   :  { %v1241_v6 = vsel %vm2037_vm8, 0.0, %v1225_v40  ;;  %v1723_v8 = vpop.eup %1722  ;;  %v1134_v21 = vpop.xlane.xlu1 %1133  ;;  %v911_v39 = vsub.f32 %v894_v63, %v1721_v13  ;;  %v3565_v63 = vld [vmem:[#allocation93_spill] sm:$0xff] }
 0x217   :  { %1265 = vadd.xlane.f32.xlu1 %v1241_v6  ;;  %v1725_v58 = vpop.eup %1724  ;;  %1740 = vlog2.f32 %v1166_v57  ;;  %v1151_v38 = vsub.f32 %v1134_v21, %v1707_v33  ;;  %v954_v43 = vmul.f32 %v1723_v8, %v3560_v41 }
 0x218   :  { %v1727_v46 = vpop.eup %1726  ;;  %1742 = vrcp.f32 %v926_v9  ;;  %v927_v32 = vmax.f32 %v911_v39, 1e-30 }
 0x219   :  { %v1729_v53 = vpop.eup %1728  ;;  %v1190_v30 = vmul.f32 0.6931472, %v1727_v46  ;;  %v1167_v52 = vmax.f32 %v1151_v38, 1e-30  ;;  %1263 = vadd.xlane.f32.xlu0 %v1240_v25  ;;  %v1226_v55 = vmul.f32 %v1210_v42, %v954_v43  ;;  %v896_v3 = vpop.xlane.xlu0 %895  ;;  %v3566_v42 = vld [vmem:[#allocation26_spill] sm:$0xff] }
 0x21a   :  { %v1731_v5 = vpop.eup %1730  ;;  %v1136_v7 = vpop.xlane.xlu1 %1135  ;;  %v955_v13 = vmul.f32 %v1729_v53, %v3563_v20 }
 0x21b   :  { %1744 = vlog2.f32 %v1167_v52  ;;  %v1152_v54 = vsub.f32 %v1136_v7, %v1725_v58  ;;  %v912_v33 = vsub.f32 %v896_v3, %v1731_v5  ;;  %v1242_v40 = vsel %vm2051_vm9, 0.0, %v1226_v55 }
 0x21c   :  { %v1733_v22 = vpop.eup %1732  ;;  %1746 = vrcp.f32 %v927_v32  ;;  %v1211_v57 = vsub.f32 %v3564_v45, %v1190_v30  ;;  %v3569_v30 = vld [vmem:[#allocation94_spill] sm:$0xff]  ;;  %v3570_v32 = vld [vmem:[#allocation28_spill] sm:$0xff] }
 0x21d   :  { %v1735_v9 = vpop.eup %1734  ;;  %v1192_v62 = vmul.f32 0.6931472, %v1733_v22  ;;  %v1168_v6 = vmax.f32 %v1152_v54, 1e-30  ;;  %v928_v8 = vmax.f32 %v912_v33, 1e-30  ;;  %1267 = vadd.xlane.f32.xlu0 %v1242_v40 }
 0x21e   :  { %v1227_v21 = vmul.f32 %v1211_v57, %v955_v13  ;;  %v956_v11 = vmul.f32 %v1735_v9, %v3565_v63  ;;  %v3572_v40 = vld [vmem:[#allocation95_spill] sm:$0xff]  ;;  %v3573_v13 = vld [vmem:[#allocation85_spill] sm:$0xff]  ;;  %v554_v63 = vsub.f32 %v3518_v12, %v2852_v60  ;;  %v557_v12 = vsub.f32 %v2751_v36, %v2876_v2 }
 0x21f   :  { %1748 = vlog2.f32 %v1168_v6  ;;  %v1212_v58 = vsub.f32 %v3566_v42, %v1192_v62 }
 0x220   :  { %v1737_v38 = vpop.eup %1736  ;;  %1750 = vrcp.f32 %v928_v8  ;;  %v1243_v41 = vsel %vm2060_vm10, 0.0, %v1227_v21 }
 0x221   :  { %v1739_v43 = vpop.eup %1738  ;;  %v1194_v46 = vmul.f32 0.6931472, %v1737_v38  ;;  %1269 = vadd.xlane.f32.xlu1 %v1243_v41  ;;  %v1228_v56 = vmul.f32 %v1212_v58, %v956_v11  ;;  %v3575_v58 = vld [vmem:[#allocation32_spill] sm:$0xff] }
 0x222   :  { %v957_v52 = vmul.f32 %v1739_v43, %v3569_v30 }
 0x223   :  { %v1244_v53 = vsel %vm2074_vm11, 0.0, %v1228_v56  ;;  %v1213_v55 = vsub.f32 %v3570_v32, %v1194_v46  ;;  %v3577_v32 = vld [vmem:[#allocation33_spill] sm:$0xff] }
 0x224   :  { %v1741_v5 = vpop.eup %1740  ;;  %1271 = vadd.xlane.f32.xlu0 %v1244_v53  ;;  %v585_v53 = vmul.f32 1.442695, %v557_v12 }
 0x225   :  { %v3052_v7 = vpop.xlane.xlu1 %337  ;;  %v1743_v3 = vpop.eup %1742  ;;  %v1196_v54 = vmul.f32 0.6931472, %v1741_v5  ;;  %v1229_v33 = vmul.f32 %v1213_v55, %v957_v52 }
 0x226   :  { %v958_v20 = vmul.f32 %v1743_v3, %v3572_v40 }
 0x227   :  { %v1245_v31 = vsel %vm2083_vm12, 0.0, %v1229_v33  ;;  %v1214_v45 = vsub.f32 %v3573_v13, %v1196_v54 }
 0x228   :  { %v1745_v57 = vpop.eup %1744  ;;  %1273 = vadd.xlane.f32.xlu1 %v1245_v31 }
 0x229   :  { %v3058_v9 = vpop.xlane.xlu1 %341  ;;  %v1747_v62 = vpop.eup %1746  ;;  %v1198_v6 = vmul.f32 0.6931472, %v1745_v57  ;;  %v1230_v21 = vmul.f32 %v1214_v45, %v958_v20  ;;  %v553_v57 = vsub.f32 %v3514_v15, %v2844_v59  ;;  %v556_v15 = vsub.f32 %v2753_v19, %v2868_v1 }
 0x22a   :  { %v3060_v8 = vpop.xlane.xlu0 %339  ;;  %v959_v42 = vmul.f32 %v1747_v62, %v2772_v35 }
 0x22b   :  { %v1246_v11 = vsel %vm2097_vm13, 0.0, %v1230_v21  ;;  %v1215_v38 = vsub.f32 %v3575_v58, %v1198_v6  ;;  %v577_v21 = vmul.f32 1.442695, %v553_v57  ;;  %v555_v58 = vsub.f32 %v2741_v29, %v2860_v4 }
 0x22c   :  { %v1749_v39 = vpop.eup %1748  ;;  %1275 = vadd.xlane.f32.xlu0 %v1246_v11  ;;  %v583_v60 = vmul.f32 1.442695, %v556_v15 }
 0x22d   :  { %v3066_v41 = vpop.xlane.xlu1 %515  ;;  %v1751_v43 = vpop.eup %1750  ;;  %v1200_v46 = vmul.f32 0.6931472, %v1749_v39  ;;  %v1231_v56 = vmul.f32 %v1215_v38, %v959_v42  ;;  %v579_v42 = vmul.f32 1.442695, %v554_v63  ;;  %v581_v59 = vmul.f32 1.442695, %v555_v58 }
 0x22e   :  { %v3068_v25 = vpop.xlane.xlu0 %513  ;;  %v960_v52 = vmul.f32 %v1751_v43, %v2783_v37 }
 0x22f   :  { %v1247_v30 = vsel %vm2106_vm14, 0.0, %v1231_v56  ;;  %v1216_v55 = vsub.f32 %v3577_v32, %v1200_v46  ;;  %v377_v32 = vsub.f32 %v3507_v28, %v2836_v51 }
 0x230   :  { %1277 = vadd.xlane.f32.xlu1 %v1247_v30  ;;  %v558_v30 = vsub.f32 %v2760_v26, %v2884_v10  ;;  %v378_v26 = vsub.f32 %v3509_v34, %v2842_v50  ;;  %v559_v10 = vsub.f32 %v2758_v17, %v2894_v24 }
 0x231   :  { %v3074_v35 = vpop.xlane.xlu1 %517  ;;  %v1232_v5 = vmul.f32 %v1216_v55, %v960_v52 }
 0x232   :  { %v3076_v3 = vpop.xlane.xlu0 %343  ;;  %v589_v50 = vmul.f32 1.442695, %v559_v10 }
 0x233   :  { %v1248_v33 = vsel %vm2120_vm15, 0.0, %v1232_v5 }
 0x234   :  { %1279 = vadd.xlane.f32.xlu0 %v1248_v33  ;;  %v587_v33 = vmul.f32 1.442695, %v558_v30 }
 0x235   :  { %v3080_v22 = vpop.xlane.xlu1 %519 }
 0x236   :  { %v3082_v31 = vpop.xlane.xlu0 %345 }
 0x239   :  { %v3084_v40 = vpop.xlane.xlu1 %521 }
 0x23a   :  { %v3086_v20 = vpop.xlane.xlu0 %347 }
 0x23d   :  { %v3088_v37 = vpop.xlane.xlu1 %523 }
 0x23e   :  { %v3090_v13 = vpop.xlane.xlu0 %349 }
 0x241   :  { %v3092_v45 = vpop.xlane.xlu1 %525 }
 0x242   :  { %v3096_v62 = vpop.xlane.xlu0 %351 }
 0x245   :  { %v3098_v6 = vpop.xlane.xlu1 %527 }
 0x246   :  { %v354_v11 = vpop.xlane.xlu0 %353 }
 0x247   :  { %1752 = vlog2.f32 %v354_v11 }
 0x248   :  { %1754 = vpow2.f32 %v577_v21 }
 0x24a   :  { %v530_v38 = vpop.xlane.xlu1 %529  ;;  %v356_v39 = vpop.xlane.xlu0 %355 }
 0x24b   :  { %1756 = vrcp.f32 %v530_v38 }
 0x24c   :  { %1758 = vlog2.f32 %v356_v39 }
 0x24d   :  { %1760 = vpow2.f32 %v579_v42 }
 0x24e   :  { %v532_v43 = vpop.xlane.xlu1 %531  ;;  %v358_v46 = vpop.xlane.xlu0 %357 }
 0x24f   :  { %1762 = vrcp.f32 %v532_v43  ;;  %v379_v43 = vsub.f32 %v3515_v61, %v2850_v27 }
 0x250   :  { %1764 = vlog2.f32 %v358_v46 }
 0x251   :  { %1766 = vpow2.f32 %v581_v59 }
 0x252   :  { %v534_v56 = vpop.xlane.xlu1 %533  ;;  %v360_v29 = vpop.xlane.xlu0 %359 }
 0x253   :  { %1768 = vrcp.f32 %v534_v56 }
 0x254   :  { %1770 = vlog2.f32 %v360_v29  ;;  %v1753_v4 = vpop.eup %1752 }
 0x255   :  { %1772 = vpow2.f32 %v583_v60  ;;  %v402_v19 = vmul.f32 0.6931472, %v1753_v4  ;;  %v1755_v52 = vpop.eup %1754  ;;  %v380_v4 = vsub.f32 %v3520_v0, %v2858_v49 }
 0x256   :  { %v536_v1 = vpop.xlane.xlu1 %535  ;;  %v362_v55 = vpop.xlane.xlu0 %361 }
 0x257   :  { %1774 = vrcp.f32 %v536_v1  ;;  %v425_v2 = vsub.f32 %v377_v32, %v402_v19 }
 0x258   :  { %v1757_v5 = vpop.eup %1756  ;;  %1776 = vlog2.f32 %v362_v55 }
 0x259   :  { %v1759_v36 = vpop.eup %1758  ;;  %v617_v54 = vmul.f32 %v1757_v5, %v1755_v52  ;;  %1778 = vpow2.f32 %v585_v53 }
 0x25a   :  { %v404_v57 = vmul.f32 0.6931472, %v1759_v36  ;;  %v364_v21 = vpop.xlane.xlu1 %363  ;;  %v1761_v63 = vpop.eup %1760  ;;  %v381_v36 = vsub.f32 %v3522_v44, %v2866_v47  ;;  %v3582_v44 = vld [vmem:[#allocation101_spill] sm:$0xff] }
 0x25b   :  { %1780 = vlog2.f32 %v364_v21  ;;  %v538_v51 = vpop.xlane.xlu0 %537  ;;  %v3116_v28 = vmul.f32 %v617_v54, %v425_v2 }
 0x25c   :  { %v1763_v11 = vpop.eup %1762  ;;  %1782 = vrcp.f32 %v538_v51  ;;  %v426_v58 = vsub.f32 %v378_v26, %v404_v57  ;;  %v382_v57 = vsub.f32 %v3523_v18, %v2874_v48 }
 0x25d   :  { %v1765_v42 = vpop.eup %1764  ;;  %v618_v38 = vmul.f32 %v1763_v11, %v1761_v63  ;;  %1784 = vpow2.f32 %v587_v33  ;;  %v3579_v63 = vld [vmem:[#allocation52_spill] sm:$0xff] }
 0x25e   :  { %v406_v39 = vmul.f32 0.6931472, %v1765_v42  ;;  %v540_v59 = vpop.xlane.xlu1 %539  ;;  %v1767_v15 = vpop.eup %1766  ;;  %v546_v26 = vsub.f32 %v3579_v63, %v2785_v14  ;;  %v3580_v11 = vld [vmem:[#allocation100_spill] sm:$0xff]  ;;  %v3581_v42 = vld [vmem:[#allocation49_spill] sm:$0xff] }
 0x25f   :  { %1786 = vrcp.f32 %v540_v59  ;;  %v366_v34 = vpop.xlane.xlu0 %365  ;;  %v3120_v17 = vmul.f32 %v618_v38, %v426_v58  ;;  %v545_v58 = vsub.f32 %v3581_v42, %v3580_v11  ;;  %v3586_v14 = vld [vmem:[#allocation105_spill] sm:$0xff]  ;;  %v3595_v11 = vld [vmem:[#allocation99_spill] sm:$0xff] }
 0x260   :  { %v1769_v24 = vpop.eup %1768  ;;  %1788 = vlog2.f32 %v366_v34  ;;  %v427_v60 = vsub.f32 %v379_v43, %v406_v39  ;;  %v3583_v39 = vld [vmem:[#allocation51_spill] sm:$0xff] }
 0x261   :  { %v1771_v46 = vpop.eup %1770  ;;  %v619_v12 = vmul.f32 %v1769_v24, %v1767_v15  ;;  %1790 = vpow2.f32 %v589_v50  ;;  %v547_v59 = vsub.f32 %v3583_v39, %v3582_v44  ;;  %v3584_v43 = vld [vmem:[#allocation103_spill] sm:$0xff]  ;;  %v3585_v50 = vld [vmem:[#allocation54_spill] sm:$0xff]  ;;  %v563_v24 = vmul.f32 1.442695, %v546_v26 }
 0x262   :  { %v408_v56 = vmul.f32 0.6931472, %v1771_v46  ;;  %v1773_v29 = vpop.eup %1772  ;;  %v548_v34 = vsub.f32 %v3585_v50, %v3584_v43  ;;  %v3587_v46 = vld [vmem:[#allocation53_spill] sm:$0xff]  ;;  %v3596_v42 = vld [vmem:[#allocation35_spill] sm:$0xff] }
 0x263   :  { %v542_v53 = vpop.xlane.xlu0 %541  ;;  %v3124_v30 = vmul.f32 %v619_v12, %v427_v60  ;;  %v549_v60 = vsub.f32 %v3587_v46, %v3586_v14  ;;  %v3588_v12 = vld [vmem:[#allocation112_spill] sm:$0xff] }
 0x264   :  { %v1775_v27 = vpop.eup %1774  ;;  %1792 = vrcp.f32 %v542_v53  ;;  %v428_v19 = vsub.f32 %v380_v4, %v408_v56  ;;  %v383_v56 = vsub.f32 %v3527_v23, %v3588_v12  ;;  %v561_v4 = vmul.f32 1.442695, %v545_v58  ;;  %v3589_v23 = vld [vmem:[#allocation107_spill] sm:$0xff]  ;;  %v3600_v14 = vld [vmem:[#allocation36_spill] sm:$0xff] }
 0x265   :  { %v1777_v61 = vpop.eup %1776  ;;  %v620_v1 = vmul.f32 %v1775_v27, %v1773_v29  ;;  %v565_v53 = vmul.f32 1.442695, %v547_v59  ;;  %1794 = vpow2.f32 %v563_v24  ;;  %v370_v58 = vsub.f32 %v3596_v42, %v3595_v11  ;;  %v3597_v59 = vld [vmem:[#allocation96_spill] sm:$0xff]  ;;  %v3599_v24 = vld [vmem:[#allocation98_spill] sm:$0xff]  ;;  %v3608_v42 = vld [vmem:[#allocation39_spill] sm:$0xff] }
 0x266   :  { %v410_v52 = vmul.f32 0.6931472, %v1777_v61  ;;  %v1779_v32 = vpop.eup %1778  ;;  %1796 = vpow2.f32 %v561_v4  ;;  %v3602_v4 = vld [vmem:[#allocation38_spill] sm:$0xff]  ;;  %v3607_v11 = vld [vmem:[#allocation108_spill] sm:$0xff] }
 0x267   :  { %v3126_v55 = vmul.f32 %v620_v1, %v428_v19  ;;  %v567_v19 = vmul.f32 1.442695, %v548_v34  ;;  %v569_v1 = vmul.f32 1.442695, %v549_v60  ;;  %1798 = vpow2.f32 %v565_v53 }
 0x268   :  { %v1781_v5 = vpop.eup %1780  ;;  %v429_v49 = vsub.f32 %v381_v36, %v410_v52  ;;  %v3591_v36 = vld [vmem:[#allocation109_spill] sm:$0xff] }
 0x269   :  { %v1783_v2 = vpop.eup %1782  ;;  %v412_v54 = vmul.f32 0.6931472, %v1781_v5  ;;  %1800 = vpow2.f32 %v567_v19 }
 0x26a   :  { %v621_v0 = vmul.f32 %v1783_v2, %v1779_v32  ;;  %v1785_v33 = vpop.eup %1784  ;;  %1802 = vpow2.f32 %v569_v1  ;;  %v3590_v32 = vld [vmem:[#allocation56_spill] sm:$0xff]  ;;  %v3592_v2 = vld [vmem:[#allocation55_spill] sm:$0xff] }
 0x26b   :  { %v430_v38 = vsub.f32 %v382_v57, %v412_v54  ;;  %1804 = vlog2.f32 %v3052_v7  ;;  %v550_v5 = vsub.f32 %v3590_v32, %v3589_v23  ;;  %v551_v54 = vsub.f32 %v3592_v2, %v3591_v36  ;;  %v3603_v2 = vld [vmem:[#allocation104_spill] sm:$0xff] }
 0x26c   :  { %v1787_v21 = vpop.eup %1786  ;;  %v3134_v10 = vmul.f32 %v621_v0, %v429_v49  ;;  %1806 = vlog2.f32 %v3058_v9  ;;  %v3594_v0 = vld [vmem:[#allocation58_spill] sm:$0xff] }
 0x26d   :  { %v1789_v51 = vpop.eup %1788  ;;  %v622_v47 = vmul.f32 %v1787_v21, %v1785_v33  ;;  %1808 = vlog2.f32 %v3060_v8  ;;  %v571_v8 = vmul.f32 1.442695, %v550_v5  ;;  %v573_v49 = vmul.f32 1.442695, %v551_v54  ;;  %v3604_v54 = vld [vmem:[#allocation37_spill] sm:$0xff] }
 0x26e   :  { %v414_v15 = vmul.f32 0.6931472, %v1789_v51  ;;  %v1791_v48 = vpop.eup %1790  ;;  %1810 = vrcp.f32 %v3066_v41 }
 0x26f   :  { %v3142_v18 = vmul.f32 %v622_v47, %v430_v38  ;;  %1812 = vrcp.f32 %v3068_v25 }
 0x270   :  { %v431_v27 = vsub.f32 %v383_v56, %v414_v15  ;;  %1814 = vrcp.f32 %v3074_v35  ;;  %v3598_v15 = vld [vmem:[#allocation34_spill] sm:$0xff] }
 0x271   :  { %v1793_v29 = vpop.eup %1792  ;;  %1816 = vlog2.f32 %v3076_v3  ;;  %v369_v43 = vsub.f32 %v3598_v15, %v3597_v59 }
 0x272   :  { %v623_v61 = vmul.f32 %v1793_v29, %v1791_v48  ;;  %1818 = vrcp.f32 %v3080_v22  ;;  %v1795_v7 = vpop.eup %1794  ;;  %v3593_v22 = vld [vmem:[#allocation111_spill] sm:$0xff]  ;;  %v3601_v29 = vld [vmem:[#allocation102_spill] sm:$0xff] }
 0x273   :  { %1820 = vlog2.f32 %v3082_v31  ;;  %v1797_v9 = vpop.eup %1796  ;;  %v552_v33 = vsub.f32 %v3594_v0, %v3593_v22  ;;  %v372_v53 = vsub.f32 %v3602_v4, %v3601_v29  ;;  %v3605_v22 = vld [vmem:[#allocation106_spill] sm:$0xff]  ;;  %v3606_v0 = vld [vmem:[#allocation40_spill] sm:$0xff] }
 0x274   :  { %v3148_v52 = vmul.f32 %v623_v61, %v431_v27  ;;  %1822 = vrcp.f32 %v3084_v40  ;;  %v1799_v41 = vpop.eup %1798 }
 0x275   :  { %1824 = vlog2.f32 %v3086_v20  ;;  %v3171_v20 = vpop.xlane.xlu1 %367 }
 0x276   :  { %v1801_v25 = vpop.eup %1800  ;;  %1826 = vrcp.f32 %v3088_v37  ;;  %v575_v37 = vmul.f32 1.442695, %v552_v33  ;;  %v374_v33 = vsub.f32 %v3606_v0, %v3605_v22 }
 0x277   :  { %v1803_v35 = vpop.eup %1802  ;;  %1828 = vlog2.f32 %v3090_v13 }
 0x278   :  { %v1805_v3 = vpop.eup %1804  ;;  %1830 = vpow2.f32 %v571_v8 }
 0x279   :  { %v1807_v31 = vpop.eup %1806  ;;  %1832 = vrcp.f32 %v3092_v45  ;;  %v386_v47 = vmul.f32 0.6931472, %v1805_v3 }
 0x27a   :  { %v1809_v57 = vpop.eup %1808  ;;  %1834 = vpow2.f32 %v573_v49  ;;  %v390_v44 = vmul.f32 0.6931472, %v1807_v31 }
 0x27b   :  { %v1811_v40 = vpop.eup %1810  ;;  %1836 = vlog2.f32 %v3096_v62  ;;  %v388_v13 = vmul.f32 0.6931472, %v1809_v57  ;;  %v417_v23 = vsub.f32 %v369_v43, %v386_v47 }
 0x27c   :  { %v1813_v21 = vpop.eup %1812  ;;  %1838 = vrcp.f32 %v3098_v6  ;;  %v610_v39 = vmul.f32 %v1811_v40, %v1795_v7  ;;  %v371_v6 = vsub.f32 %v3600_v14, %v3599_v24  ;;  %v373_v7 = vsub.f32 %v3604_v54, %v3603_v2 }
 0x27d   :  { %v1815_v63 = vpop.eup %1814  ;;  %1840 = vpow2.f32 %v575_v37  ;;  %v418_v46 = vsub.f32 %v370_v58, %v388_v13  ;;  %v609_v60 = vmul.f32 %v1813_v21, %v1797_v9  ;;  %v375_v58 = vsub.f32 %v3608_v42, %v3607_v11 }
 0x27e   :  { %v1817_v26 = vpop.eup %1816  ;;  %v1250_v34 = vpop.xlane.xlu0 %1249  ;;  %v611_v12 = vmul.f32 %v1815_v63, %v1799_v41  ;;  %v419_v32 = vsub.f32 %v371_v6, %v390_v44  ;;  %v3609_v44 = vld [vmem:[#allocation97_spill] sm:$0xff]  ;;  %1842 = vlog2.f32 %v3171_v20 }
 0x27f   :  { %v1819_v51 = vpop.eup %1818  ;;  %v392_v50 = vmul.f32 0.6931472, %v1817_v26  ;;  %v626_v5 = vmul.f32 %v610_v39, %v418_v46  ;;  %v625_v31 = vmul.f32 %v609_v60, %v417_v23  ;;  %v560_v39 = vsub.f32 %v3609_v44, %v3007_v16  ;;  %v3610_v16 = vld [vmem:[#allocation110_spill] sm:$0xff] }
 0x280   :  { %v1821_v45 = vpop.eup %1820  ;;  %v612_v61 = vmul.f32 %v1819_v51, %v1801_v25  ;;  %v627_v25 = vmul.f32 %v611_v12, %v419_v32 }
 0x281   :  { %v1823_v62 = vpop.eup %1822  ;;  %v394_v27 = vmul.f32 0.6931472, %v1821_v45  ;;  %v420_v8 = vsub.f32 %v372_v53, %v392_v50  ;;  %v1281_v45 = vmul.f32 -1.0, %v1250_v34  ;;  %v642_v47 = vsub.f32 0.0, %v626_v5  ;;  %v3611_v53 = vld [vmem:[#allocation42_spill] sm:$0xff] }
 0x282   :  { %v1825_v48 = vpop.eup %1824  ;;  %v613_v9 = vmul.f32 %v1823_v62, %v1803_v35  ;;  %v641_v43 = vsub.f32 0.0, %v625_v31 }
 0x283   :  { %v1827_v56 = vpop.eup %1826  ;;  %v396_v49 = vmul.f32 0.6931472, %v1825_v48  ;;  %v421_v21 = vsub.f32 %v373_v7, %v394_v27  ;;  %v628_v63 = vmul.f32 %v612_v61, %v420_v8  ;;  %v643_v48 = vsub.f32 0.0, %v627_v25 }
 0x284   :  { %v1252_v38 = vpop.xlane.xlu1 %1251  ;;  %v1829_v1 = vpop.eup %1828  ;;  %v1297_v34 = vadd.f32 %v1281_v45, %v641_v43  ;;  %v376_v27 = vsub.f32 %v3611_v53, %v3610_v16  ;;  %v591_v61 = vmul.f32 1.442695, %v560_v39  ;;  %v3613_v43 = vld [vmem:[#allocation50_spill] sm:$0xff] }
 0x285   :  { %v1831_v36 = vpop.eup %1830  ;;  %v1282_v57 = vmul.f32 -1.0, %v1252_v38  ;;  %v398_v37 = vmul.f32 0.6931472, %v1829_v1  ;;  %v422_v62 = vsub.f32 %v374_v33, %v396_v49  ;;  %v629_v59 = vmul.f32 %v613_v9, %v421_v21 }
 0x286   :  { %v1833_v41 = vpop.eup %1832  ;;  %v614_v26 = vmul.f32 %v1831_v36, %v1827_v56  ;;  %v644_v60 = vsub.f32 0.0, %v628_v63  ;;  %1844 = vpow2.f32 %v591_v61 }
 0x287   :  { %v1835_v40 = vpop.eup %1834  ;;  %v1298_v50 = vadd.f32 %v1282_v57, %v642_v47  ;;  %v423_v6 = vsub.f32 %v375_v58, %v398_v37  ;;  %v645_v1 = vsub.f32 0.0, %v629_v59  ;;  %v650_v47 = vsub.f32 0.0, %v3120_v17 }
 0x288   :  { %v1254_v3 = vpop.xlane.xlu0 %1253  ;;  %v1837_v51 = vpop.eup %1836  ;;  %v615_v15 = vmul.f32 %v1835_v40, %v1833_v41  ;;  %v630_v12 = vmul.f32 %v614_v26, %v422_v62  ;;  %v652_v17 = vsub.f32 0.0, %v3126_v55  ;;  %v655_v55 = vsub.f32 0.0, %v3148_v52 }
 0x289   :  { %v1283_v35 = vmul.f32 -1.0, %v1254_v3  ;;  %v1839_v14 = vpop.eup %1838  ;;  %v400_v46 = vmul.f32 0.6931472, %v1837_v51  ;;  %v1313_v5 = vadd.f32 %v1298_v50, %v1297_v34 }
 0x28a   :  { %v1841_v4 = vpop.eup %1840  ;;  %v631_v32 = vmul.f32 %v615_v15, %v423_v6  ;;  %v646_v54 = vsub.f32 0.0, %v630_v12  ;;  %v3612_v15 = vld [vmem:[#allocation113_spill] sm:$0xff] }
 0x28b   :  { %v1299_v56 = vadd.f32 %v1283_v35, %v643_v48  ;;  %v616_v2 = vmul.f32 %v1841_v4, %v1839_v14  ;;  %v424_v7 = vsub.f32 %v376_v27, %v400_v46  ;;  %v1843_v11 = vpop.eup %1842  ;;  %v384_v50 = vsub.f32 %v3613_v43, %v3612_v15 }
 0x28c   :  { %v1256_v19 = vpop.xlane.xlu1 %1255  ;;  %v647_v3 = vsub.f32 0.0, %v631_v32  ;;  %v416_v44 = vmul.f32 0.6931472, %v1843_v11  ;;  %v653_v27 = vsub.f32 0.0, %v3134_v10  ;;  %v654_v32 = vsub.f32 0.0, %v3142_v18 }
 0x28d   :  { %v1284_v24 = vmul.f32 -1.0, %v1256_v19  ;;  %v1314_v8 = vadd.f32 %v1313_v5, %v1299_v56  ;;  %v632_v0 = vmul.f32 %v616_v2, %v424_v7 }
 0x28e   :  { %v432_v6 = vsub.f32 %v384_v50, %v416_v44 }
 0x28f   :  { %v1300_v19 = vadd.f32 %v1284_v24, %v644_v60  ;;  %v648_v37 = vsub.f32 0.0, %v632_v0  ;;  %v651_v24 = vsub.f32 0.0, %v3124_v30 }
 0x290   :  { %v1258_v38 = vpop.xlane.xlu0 %1257 }
 0x291   :  { %v1285_v29 = vmul.f32 -1.0, %v1258_v38  ;;  %v1315_v41 = vadd.f32 %v1314_v8, %v1300_v19 }
 0x293   :  { %v1301_v49 = vadd.f32 %v1285_v29, %v645_v1  ;;  %v1845_v38 = vpop.eup %1844 }
 0x294   :  { %v1260_v13 = vpop.xlane.xlu1 %1259 }
 0x295   :  { %v1286_v36 = vmul.f32 -1.0, %v1260_v13  ;;  %v1316_v31 = vadd.f32 %v1315_v41, %v1301_v49  ;;  %v649_v13 = vsub.f32 0.0, %v3116_v28 }
 0x297   :  { %v1302_v22 = vadd.f32 %v1286_v36, %v646_v54 }
 0x298   :  { %v1262_v23 = vpop.xlane.xlu1 %1261 }
 0x299   :  { %v1287_v20 = vmul.f32 -1.0, %v1262_v23  ;;  %v1317_v40 = vadd.f32 %v1316_v31, %v1302_v22 }
 0x29b   :  { %v1303_v57 = vadd.f32 %v1287_v20, %v647_v3 }
 0x29d   :  { %v1318_v26 = vadd.f32 %v1317_v40, %v1303_v57 }
 0x29e   :  { %v544_v9 = vpop.xlane.xlu0 %543 }
 0x29f   :  { %1846 = vrcp.f32 %v544_v9 }
 0x2a0   :  { %v1266_v33 = vpop.xlane.xlu1 %1265 }
 0x2a1   :  { %v1289_v21 = vmul.f32 -1.0, %v1266_v33 }
 0x2a2   :  { %v1264_v25 = vpop.xlane.xlu0 %1263 }
 0x2a3   :  { %v1288_v63 = vmul.f32 -1.0, %v1264_v25  ;;  %v1305_v58 = vadd.f32 %v1289_v21, %v649_v13 }
 0x2a5   :  { %v1304_v51 = vadd.f32 %v1288_v63, %v648_v37 }
 0x2a6   :  { %v1268_v42 = vpop.xlane.xlu0 %1267 }
 0x2a7   :  { %v1319_v45 = vadd.f32 %v1318_v26, %v1304_v51  ;;  %v1290_v35 = vmul.f32 -1.0, %v1268_v42 }
 0x2a9   :  { %v1320_v39 = vadd.f32 %v1319_v45, %v1305_v58  ;;  %v1306_v62 = vadd.f32 %v1290_v35, %v650_v47 }
 0x2aa   :  { %v1270_v59 = vpop.xlane.xlu1 %1269 }
 0x2ab   :  { %v1321_v48 = vadd.f32 %v1320_v39, %v1306_v62  ;;  %v1291_v28 = vmul.f32 -1.0, %v1270_v59 }
 0x2ac   :  { %v1847_v14 = vpop.eup %1846 }
 0x2ad   :  { %v1307_v46 = vadd.f32 %v1291_v28, %v651_v24  ;;  %v1272_v60 = vpop.xlane.xlu0 %1271  ;;  %v624_v12 = vmul.f32 %v1847_v14, %v1845_v38 }
 0x2ae   :  { %v1292_v34 = vmul.f32 -1.0, %v1272_v60 }
 0x2af   :  { %v1322_v56 = vadd.f32 %v1321_v48, %v1307_v46  ;;  %v640_v29 = vmul.f32 %v624_v12, %v432_v6 }
 0x2b0   :  { %v1308_v4 = vadd.f32 %v1292_v34, %v652_v17 }
 0x2b1   :  { %v1274_v16 = vpop.xlane.xlu1 %1273  ;;  %v656_v20 = vsub.f32 0.0, %v640_v29 }
 0x2b2   :  { %v1323_v53 = vadd.f32 %v1322_v56, %v1308_v4  ;;  %v1293_v61 = vmul.f32 -1.0, %v1274_v16 }
 0x2b4   :  { %v1309_v1 = vadd.f32 %v1293_v61, %v653_v27 }
 0x2b5   :  { %v1276_v23 = vpop.xlane.xlu0 %1275 }
 0x2b6   :  { %v1324_v30 = vadd.f32 %v1323_v53, %v1309_v1  ;;  %v1294_v5 = vmul.f32 -1.0, %v1276_v23 }
 0x2b8   :  { %v1310_v19 = vadd.f32 %v1294_v5, %v654_v32 }
 0x2b9   :  { %v1278_v36 = vpop.xlane.xlu1 %1277 }
 0x2ba   :  { %v1325_v2 = vadd.f32 %v1324_v30, %v1310_v19  ;;  %v1295_v54 = vmul.f32 -1.0, %v1278_v36 }
 0x2bc   :  { %v1311_v7 = vadd.f32 %v1295_v54, %v655_v55 }
 0x2bd   :  { %v1280_v8 = vpop.xlane.xlu0 %1279 }
 0x2be   :  { %v1326_v49 = vadd.f32 %v1325_v2, %v1311_v7  ;;  %v1296_v3 = vmul.f32 -1.0, %v1280_v8 }
 0x2c0   :  { %v1312_v9 = vadd.f32 %v1296_v3, %v656_v20 }
 0x2c2   :  { %v1327_v10 = vadd.f32 %v1326_v49, %v1312_v9 }
 0x2c4   :  { %v1328_v41 = vrot.slane %v1327_v10, 4 }
 0x2c6   :  { %v1329_v22 = vadd.f32 %v1328_v41, %v1327_v10 }
 0x2c8   :  { %v1330_v0 = vrot.slane %v1329_v22, 2 }
 0x2ca   :  { %v1331_v33 = vadd.f32 %v1330_v0, %v1329_v22 }
 0x2cc   :  { %v1332_v18 = vrot.slane %v1331_v33, 1 }
 0x2ce   :  { %v1333_v31 = vadd.f32 %v1332_v18, %v1331_v33 }
 0x2d0   :  { %1335 = vst.msk [vmem:[#allocation2] sm:$0x1] %vm1334_vm0, %v1333_v31 }
 0x2d1   :  { %1859 = shalt.err (!%p1856_p4)
}
 0x2d2   :  { %1345 = dma.vmem_to_hbm [thread:$0]  %s1343_s20, 16, %s3208_s3, [#allocation3]  }
 0x2d3   :  { %1868 = dma.done.wait [#allocation3], 16  }
 0x2d4   :  { %1869 = vsyncadd [#allocation3], 4294967280 }
 0x2d5   :  { %1349 = vsyncpa [#allocation3], 1 }

</bundles_post_ra>
